<compile_context>
chip_gen: v7x
topology: tpu7x:2x2x1
jax: 0.10.0
libtpu: 0.0.40
codegen_flags: <defaults>
</compile_context>

<pallas_src>
import jax
import jax.numpy as jnp
from jax import lax
from jax.experimental import pallas as pl
from jax.experimental.pallas import tpu as pltpu
import numpy as np

ENT_TYPE_SIZE = 10   # E
INNER_DIM = 64       # D
HIDDEN = 32          # H (stands in for config.hidden_size)
BATCH = 2            # B
SEQ = 8              # S
PROJ = ENT_TYPE_SIZE * INNER_DIM * 2  # P = 1280


def global_pointer_kernel(hs_ref, w_ref, wr_ref, b_ref, br_ref,
                          cos_ref, sin_ref, am_ref, o_ref, p0_ref, p1_ref):
    """One batch-block per grid step: two projections + RoPE + per-type q@k^T + masking.

    hs_ref  : [bb*S, H]      bf16
    w_ref   : [H, P]         bf16   (dense weight)
    wr_ref  : [H, P]         bf16   (dense weight with RoPE rotation folded in)
    b_ref   : [1, P]         f32
    br_ref  : [1, P]         f32
    cos_ref : [bb*S, 2*D]    f32    (D-pattern duplicated; shared by all E chunks)
    sin_ref : [bb*S, 2*D]    f32
    am_ref  : [bb, 1, S]     f32
    o_ref   : [bb*S, pad128(E*S)] f32  (lane-dense packed logits)
    p0_ref, p1_ref : [bb*S, P] f32 VMEM scratch (projection / rotated projection)
    """
    P = w_ref.shape[1]
    D = INNER_DIM
    E = P // (2 * D)
    bb = am_ref.shape[0]
    S = am_ref.shape[2]
    bbS = bb * S
    out_lanes = o_ref.shape[1]
    scale = 1.0 / (D ** 0.5)

    # Two dense projections in two big MXU passes (bf16 operands, f32 accumulate).
    # Spill each to VMEM scratch immediately so only 128-lane chunks are live later.
    p0_ref[...] = jnp.dot(hs_ref[...], w_ref[...],
                          preferred_element_type=jnp.float32) + b_ref[...]
    p1_ref[...] = jnp.dot(hs_ref[...], wr_ref[...],
                          preferred_element_type=jnp.float32) + br_ref[...]

    cs = cos_ref[...]                                   # [bbS, 2D]
    sn = sin_ref[...]

    # Hoisted masks, built once over the whole batch block.
    row = lax.broadcasted_iota(jnp.int32, (bbS, S), 0)  # global row (query) index
    col = lax.broadcasted_iota(jnp.int32, (bbS, S), 1)  # key position within S
    am = am_ref[...]                                    # [bb, 1, S]
    padm = jnp.broadcast_to(am[0], (bbS, S))            # pad[r, n] = mask[r // S, n]
    for bi in range(1, bb):
        padm = jnp.where(row >= bi * S, jnp.broadcast_to(am[bi], (bbS, S)), padm)
    trilm = ((row % S) > col).astype(jnp.float32)       # strict lower triangle per batch
    # Fused mask: logits_final = lg * mask_mul + mask_add
    mask_mul = padm * scale
    mask_add = (padm - 1.0 - trilm) * (1e12 * scale)

    dn = (((1,), (1,)), ((), ()))                       # contract last dims (no transpose)
    for e in range(E):
        c0 = e * 2 * D                                  # 128-lane-aligned chunk [q_e | k_e]
        ro = (p0_ref[:, c0:c0 + 2 * D] * cs
              + p1_ref[:, c0:c0 + 2 * D] * sn)          # RoPE'd [bbS, 2D]
        q = ro[:, :D]
        k = ro[:, D:]
        # One matmul over the whole batch block (cross-batch blocks are discarded).
        lg = lax.dot_general(q, k, dn, preferred_element_type=jnp.float32)  # [bbS, bbS]
        # Pick the per-batch diagonal S x S blocks with a row-indexed select.
        v = lg[:, 0:S]
        for bi in range(1, bb):
            v = jnp.where(row >= bi * S, lg[:, bi * S:(bi + 1) * S], v)
        o_ref[:, e * S:(e + 1) * S] = v * mask_mul + mask_add

    # Deterministically zero the lane padding of the output block.
    if out_lanes > E * S:
        o_ref[:, E * S:out_lanes] = jnp.zeros((bbS, out_lanes - E * S), jnp.float32)


def make_rope_tables(S, D):
    """cos/sin tables matching torch sinusoidal_position_embedding + repeat_interleave."""
    pos = jnp.arange(S, dtype=jnp.float32)[:, None]              # [S, 1]
    idx = jnp.arange(D // 2, dtype=jnp.float32)
    theta = jnp.power(10000.0, -2.0 * idx / D)                   # [D/2]
    ang = pos * theta                                            # [S, D/2]
    cos_pos = jnp.repeat(jnp.cos(ang), 2, axis=-1)               # [S, D]
    sin_pos = jnp.repeat(jnp.sin(ang), 2, axis=-1)               # [S, D]
    return cos_pos, sin_pos


def _default_batch_block(B, S):
    """Only keep batch as a parallel grid axis (2-TC v7x) when each core gets
    substantial work; at tiny shapes the ~0.35us/step overhead dominates, so
    collapse to a single grid step and fold B into the matmul M dimension."""
    try:
        kind = jax.devices()[0].device_kind.lower()
    except Exception:
        kind = ""
    if "v7" in kind and B % 2 == 0 and (B // 2) * S >= 256:
        return B // 2
    return B


def global_pointer_forward(last_hidden_state, attention_mask, W, bvec,
                           *, batch_block=None):
    B, S, H = last_hidden_state.shape
    E, D = ENT_TYPE_SIZE, INNER_DIM
    P = E * D * 2
    ES = E * S
    out_lanes = ((ES + 127) // 128) * 128                # lane-dense padded output slab

    bb = _default_batch_block(B, S) if batch_block is None else batch_block
    assert B % bb == 0
    nb = B // bb

    # Fold the RoPE rotation into a second projection.  Within every 64-wide
    # q/k sub-chunk: rot(x)[2j] = -x[2j+1], rot(x)[2j+1] = x[2j]; every sub-chunk
    # starts at an even column, so globally partner = c +/- 1 with sign -1 on even.
    colP = jnp.arange(P)
    partner = jnp.where(colP % 2 == 0, colP + 1, colP - 1)
    sign = jnp.where(colP % 2 == 0, -1.0, 1.0).astype(W.dtype)
    W_rot = W[:, partner] * sign
    b_rot = bvec[partner] * sign

    # Compact RoPE tables [bb*S, 2*D]: the repeat-interleaved D pattern duplicated
    # (q half | k half); every one of the E 128-lane projection chunks reuses it.
    cos_d, sin_d = make_rope_tables(S, D)
    cos_c = jnp.tile(jnp.concatenate([cos_d, cos_d], axis=1), (bb, 1))   # [bb*S, 2D]
    sin_c = jnp.tile(jnp.concatenate([sin_d, sin_d], axis=1), (bb, 1))

    # bf16 operands for the projections (f32 accumulation in-kernel);
    # RoPE / masking stay f32.
    hs2 = last_hidden_state.reshape(B * S, H).astype(jnp.bfloat16)
    w_bf = W.astype(jnp.bfloat16)
    wr_bf = W_rot.astype(jnp.bfloat16)
    b2 = bvec.reshape(1, P).astype(jnp.float32)
    br2 = b_rot.reshape(1, P).astype(jnp.float32)
    am3 = attention_mask.astype(jnp.float32).reshape(B, 1, S)

    # NOTE: W / W_rot / biases / cos / sin are grid-invariant (constant index_map);
    # with the collapsed grid (nb == 1) double-buffering them is moot.  At
    # production shapes single-buffer them (pipeline_mode) and set
    # vmem_limit_bytes explicitly (v7x: 64 MiB physical / 32 MiB scoped default).
    grid_spec = pltpu.PrefetchScalarGridSpec(
        num_scalar_prefetch=0,
        grid=(nb,),
        in_specs=[
            pl.BlockSpec((bb * S, H), lambda b: (b, 0)),        # hidden states
            pl.BlockSpec((H, P), lambda b: (0, 0)),             # dense weight
            pl.BlockSpec((H, P), lambda b: (0, 0)),             # rotated dense weight
            pl.BlockSpec((1, P), lambda b: (0, 0)),             # dense bias
            pl.BlockSpec((1, P), lambda b: (0, 0)),             # rotated dense bias
            pl.BlockSpec((bb * S, 2 * D), lambda b: (0, 0)),    # compact cos table
            pl.BlockSpec((bb * S, 2 * D), lambda b: (0, 0)),    # compact sin table
            pl.BlockSpec((bb, 1, S), lambda b: (b, 0, 0)),      # attention mask
        ],
        out_specs=pl.BlockSpec((bb * S, out_lanes), lambda b: (b, 0)),
        scratch_shapes=[pltpu.VMEM((bb * S, P), jnp.float32),   # projection
                        pltpu.VMEM((bb * S, P), jnp.float32)],  # rotated projection
    )

    flops = 2 * 2 * (B * S) * H * P + 2 * E * D * (bb * S) * (bb * S) * nb
    bytes_accessed = (hs2.size * 2 + w_bf.size * 2 + wr_bf.size * 2
                      + b2.size * 4 + br2.size * 4
                      + cos_c.size * 4 + sin_c.size * 4 + am3.size * 4
                      + B * S * out_lanes * 4)
    ce = pl.CostEstimate(flops=int(flops), transcendentals=0,
                         bytes_accessed=int(bytes_accessed))

    sem = ("arbitrary",) if nb == 1 else ("parallel",)
    packed = pl.pallas_call(
        global_pointer_kernel,
        out_shape=jax.ShapeDtypeStruct((B * S, out_lanes), jnp.float32),
        grid_spec=grid_spec,
        compiler_params=pltpu.CompilerParams(dimension_semantics=sem),
        cost_estimate=ce,
    )(hs2, w_bf, wr_bf, b2, br2, cos_c, sin_c, am3)

    # Strip lane padding and unpack [B*S, E*S] -> [B, E, S, S] (layout plumbing,
    # done outside the kernel).
    return packed[:, :ES].reshape(B, S, E, S).transpose(0, 2, 1, 3)


def global_pointer_reference(last_hidden_state, attention_mask, W, bvec):
    """Pure-JAX f32 reference mirroring the PyTorch forward (post-encoder)."""
    B, S, H = last_hidden_state.shape
    E, D = ENT_TYPE_SIZE, INNER_DIM
    out = last_hidden_state @ W + bvec                       # [B, S, P]
    out = out.reshape(B, S, E, 2 * D)
    qw, kw = out[..., :D], out[..., D:]

    cos_pos, sin_pos = make_rope_tables(S, D)
    cos_pos = cos_pos[None, :, None, :]
    sin_pos = sin_pos[None, :, None, :]

    def rot(x):
        x2 = jnp.stack([-x[..., 1::2], x[..., ::2]], axis=-1)
        return x2.reshape(x.shape)

    qw = qw * cos_pos + rot(qw) * sin_pos
    kw = kw * cos_pos + rot(kw) * sin_pos

    logits = jnp.einsum('bmhd,bnhd->bhmn', qw, kw)
    pad = attention_mask.astype(jnp.float32)[:, None, None, :]  # [B,1,1,S]
    logits = logits * pad - (1.0 - pad) * 1e12
    tril = jnp.tril(jnp.ones((S, S), jnp.float32), -1)
    logits = logits - tril * 1e12
    return logits / (D ** 0.5)


if __name__ == "__main__":
    key = jax.random.PRNGKey(0)
    k_hs, k_w, k_b = jax.random.split(key, 3)

    last_hidden_state = jax.random.normal(k_hs, (BATCH, SEQ, HIDDEN), jnp.float32)
    # attention_mask: first few tokens valid, rest padding
    attention_mask = jnp.array(
        [[1, 1, 1, 1, 1, 1, 0, 0],
         [1, 1, 1, 1, 0, 0, 0, 0]], dtype=jnp.float32)
    W = jax.random.normal(k_w, (HIDDEN, PROJ), jnp.float32) * 0.05
    bvec = jax.random.normal(k_b, (PROJ,), jnp.float32) * 0.01

    out = global_pointer_forward(last_hidden_state, attention_mask, W, bvec)
    out = jax.block_until_ready(out)

    ref = global_pointer_reference(last_hidden_state, attention_mask, W, bvec)
    ref = jax.block_until_ready(ref)

    # Tolerance loosened vs. the f32 reference because the projection operands
    # are bf16 (f32 accumulation); RoPE / masking remain f32.
    np.testing.assert_allclose(np.asarray(out), np.asarray(ref), rtol=2e-2, atol=3e-2)
    print("KERNEL_OK")
</pallas_src>

<mosaic_0001>
module attributes {stable_mosaic.version = 11 : i64} {
  func.func @global_pointer_kernel(%arg0: i32, %arg1: memref<16x32xbf16, #tpu.memory_space<vmem>>, %arg2: memref<32x1280xbf16, #tpu.memory_space<vmem>>, %arg3: memref<32x1280xbf16, #tpu.memory_space<vmem>>, %arg4: memref<1x1280xf32, #tpu.memory_space<vmem>>, %arg5: memref<1x1280xf32, #tpu.memory_space<vmem>>, %arg6: memref<16x128xf32, #tpu.memory_space<vmem>>, %arg7: memref<16x128xf32, #tpu.memory_space<vmem>>, %arg8: memref<2x1x8xf32, #tpu.memory_space<vmem>>, %arg9: memref<16x128xf32, #tpu.memory_space<vmem>>, %arg10: memref<16x1280xf32, #tpu.memory_space<vmem>>, %arg11: memref<16x1280xf32, #tpu.memory_space<vmem>>) attributes {dimension_semantics = [#tpu.dimension_semantics<arbitrary>], iteration_bounds = array<i64: 1>, scalar_prefetch = 0 : i64, scratch_operands = 2 : i64, tpu.core_type = #tpu.core_type<tc>, window_params = [{transform_indices = @transform_0, window_bounds = array<i64: 16, 32>}, {pipeline_mode = #tpu.pipeline_mode<synchronous>, transform_indices = @transform_1, window_bounds = array<i64: 32, 1280>}, {pipeline_mode = #tpu.pipeline_mode<synchronous>, transform_indices = @transform_2, window_bounds = array<i64: 32, 1280>}, {pipeline_mode = #tpu.pipeline_mode<synchronous>, transform_indices = @transform_3, window_bounds = array<i64: 1, 1280>}, {pipeline_mode = #tpu.pipeline_mode<synchronous>, transform_indices = @transform_4, window_bounds = array<i64: 1, 1280>}, {pipeline_mode = #tpu.pipeline_mode<synchronous>, transform_indices = @transform_5, window_bounds = array<i64: 16, 128>}, {pipeline_mode = #tpu.pipeline_mode<synchronous>, transform_indices = @transform_6, window_bounds = array<i64: 16, 128>}, {transform_indices = @transform_7, window_bounds = array<i64: 2, 1, 8>}, {transform_indices = @transform_8, window_bounds = array<i64: 16, 128>}]} {
    %c0 = arith.constant 0 : index
    %c0_0 = arith.constant 0 : index
    %0 = vector.load %arg1[%c0, %c0_0] : memref<16x32xbf16, #tpu.memory_space<vmem>>, vector<16x32xbf16>
    %c0_1 = arith.constant 0 : index
    %c0_2 = arith.constant 0 : index
    %1 = vector.load %arg2[%c0_1, %c0_2] : memref<32x1280xbf16, #tpu.memory_space<vmem>>, vector<32x1280xbf16>
    %cst = arith.constant dense<0.000000e+00> : vector<16x1280xf32>
    %2 = tpu.matmul %0, %1, %cst {dimension_numbers = #tpu.dot_dimension_numbers<[1], [0], [0], [1], [0, 0, 1, 1], [], []>} : vector<16x32xbf16>, vector<32x1280xbf16>, vector<16x1280xf32> -> vector<16x1280xf32>
    %c0_3 = arith.constant 0 : index
    %c0_4 = arith.constant 0 : index
    %3 = vector.load %arg4[%c0_3, %c0_4] : memref<1x1280xf32, #tpu.memory_space<vmem>>, vector<1x1280xf32>
    %4 = vector.broadcast %3 : vector<1x1280xf32> to vector<16x1280xf32>
    %5 = arith.addf %2, %4 : vector<16x1280xf32>
    %c0_5 = arith.constant 0 : index
    %c0_6 = arith.constant 0 : index
    %6 = vector.load %arg10[%c0_5, %c0_6] : memref<16x1280xf32, #tpu.memory_space<vmem>>, vector<16x1280xf32>
    tpu.vector_store %arg10[%c0_5, %c0_6], %5 {strides = array<i32>} : memref<16x1280xf32, #tpu.memory_space<vmem>>, vector<16x1280xf32>,
    %c0_7 = arith.constant 0 : index
    %c0_8 = arith.constant 0 : index
    %7 = vector.load %arg1[%c0_7, %c0_8] : memref<16x32xbf16, #tpu.memory_space<vmem>>, vector<16x32xbf16>
    %c0_9 = arith.constant 0 : index
    %c0_10 = arith.constant 0 : index
    %8 = vector.load %arg3[%c0_9, %c0_10] : memref<32x1280xbf16, #tpu.memory_space<vmem>>, vector<32x1280xbf16>
    %cst_11 = arith.constant dense<0.000000e+00> : vector<16x1280xf32>
    %9 = tpu.matmul %7, %8, %cst_11 {dimension_numbers = #tpu.dot_dimension_numbers<[1], [0], [0], [1], [0, 0, 1, 1], [], []>} : vector<16x32xbf16>, vector<32x1280xbf16>, vector<16x1280xf32> -> vector<16x1280xf32>
    %c0_12 = arith.constant 0 : index
    %c0_13 = arith.constant 0 : index
    %10 = vector.load %arg5[%c0_12, %c0_13] : memref<1x1280xf32, #tpu.memory_space<vmem>>, vector<1x1280xf32>
    %11 = vector.broadcast %10 : vector<1x1280xf32> to vector<16x1280xf32>
    %12 = arith.addf %9, %11 : vector<16x1280xf32>
    %c0_14 = arith.constant 0 : index
    %c0_15 = arith.constant 0 : index
    %13 = vector.load %arg11[%c0_14, %c0_15] : memref<16x1280xf32, #tpu.memory_space<vmem>>, vector<16x1280xf32>
    tpu.vector_store %arg11[%c0_14, %c0_15], %12 {strides = array<i32>} : memref<16x1280xf32, #tpu.memory_space<vmem>>, vector<16x1280xf32>,
    %c0_16 = arith.constant 0 : index
    %c0_17 = arith.constant 0 : index
    %14 = vector.load %arg6[%c0_16, %c0_17] : memref<16x128xf32, #tpu.memory_space<vmem>>, vector<16x128xf32>
    %c0_18 = arith.constant 0 : index
    %c0_19 = arith.constant 0 : index
    %15 = vector.load %arg7[%c0_18, %c0_19] : memref<16x128xf32, #tpu.memory_space<vmem>>, vector<16x128xf32>
    %16 = tpu.iota {dimensions = array<i32: 0>} : vector<16x8xi32>
    %17 = tpu.iota {dimensions = array<i32: 1>} : vector<16x8xi32>
    %c0_20 = arith.constant 0 : index
    %c0_21 = arith.constant 0 : index
    %c0_22 = arith.constant 0 : index
    %18 = vector.load %arg8[%c0_20, %c0_21, %c0_22] : memref<2x1x8xf32, #tpu.memory_space<vmem>>, vector<2x1x8xf32>
    %19 = vector.extract_strided_slice %18 {offsets = [0, 0, 0], sizes = [1, 1, 8], strides = [1, 1, 1]} : vector<2x1x8xf32> to vector<1x1x8xf32>
    %20 = vector.shape_cast %19 : vector<1x1x8xf32> to vector<1x8xf32>
    %21 = vector.shape_cast %20 : vector<1x8xf32> to vector<1x8xf32>
    %22 = vector.broadcast %21 : vector<1x8xf32> to vector<16x8xf32>
    %c8_i32 = arith.constant 8 : i32
    %23 = vector.broadcast %c8_i32 : i32 to vector<16x8xi32>
    %24 = arith.cmpi sge, %16, %23 : vector<16x8xi32>
    %25 = vector.extract_strided_slice %18 {offsets = [1, 0, 0], sizes = [1, 1, 8], strides = [1, 1, 1]} : vector<2x1x8xf32> to vector<1x1x8xf32>
    %26 = vector.shape_cast %25 : vector<1x1x8xf32> to vector<1x8xf32>
    %27 = vector.shape_cast %26 : vector<1x8xf32> to vector<1x8xf32>
    %28 = vector.broadcast %27 : vector<1x8xf32> to vector<16x8xf32>
    %29 = arith.select %24, %28, %22 : vector<16x8xi1>, vector<16x8xf32>
    %c8_i32_23 = arith.constant 8 : i32
    %c0_i32 = arith.constant 0 : i32
    %30 = arith.cmpi eq, %c8_i32_23, %c0_i32 : i32
    %c1_i32 = arith.constant 1 : i32
    %31 = arith.select %30, %c1_i32, %c8_i32_23 : i32
    %32 = vector.broadcast %31 : i32 to vector<16x8xi32>
    %33 = arith.remsi %16, %32 : vector<16x8xi32>
    %c0_i32_24 = arith.constant 0 : i32
    %34 = vector.broadcast %c0_i32_24 : i32 to vector<16x8xi32>
    %35 = arith.cmpi ne, %33, %34 : vector<16x8xi32>
    %c0_i32_25 = arith.constant 0 : i32
    %36 = vector.broadcast %c0_i32_25 : i32 to vector<16x8xi32>
    %37 = arith.cmpi slt, %33, %36 : vector<16x8xi32>
    %c0_i32_26 = arith.constant 0 : i32
    %38 = arith.cmpi slt, %31, %c0_i32_26 : i32
    %39 = vector.broadcast %38 : i1 to vector<16x8xi1>
    %40 = vector.broadcast %39 : vector<16x8xi1> to vector<16x8xi1>
    %41 = arith.xori %37, %40 : vector<16x8xi1>
    %42 = arith.andi %41, %35 : vector<16x8xi1>
    %43 = vector.broadcast %31 : i32 to vector<16x8xi32>
    %44 = arith.addi %33, %43 : vector<16x8xi32>
    %45 = arith.select %42, %44, %33 : vector<16x8xi1>, vector<16x8xi32>
    %46 = arith.cmpi sgt, %45, %17 : vector<16x8xi32>
    %47 = arith.extui %46 : vector<16x8xi1> to vector<16x8xi32>
    %48 = arith.sitofp %47 : vector<16x8xi32> to vector<16x8xf32>
    %cst_27 = arith.constant 1.250000e-01 : f32
    %49 = vector.broadcast %cst_27 : f32 to vector<16x8xf32>
    %50 = arith.mulf %29, %49 : vector<16x8xf32>
    %cst_28 = arith.constant 1.000000e+00 : f32
    %51 = vector.broadcast %cst_28 : f32 to vector<16x8xf32>
    %52 = arith.subf %29, %51 : vector<16x8xf32>
    %53 = arith.subf %52, %48 : vector<16x8xf32>
    %cst_29 = arith.constant 1.250000e+11 : f32
    %54 = vector.broadcast %cst_29 : f32 to vector<16x8xf32>
    %55 = arith.mulf %53, %54 : vector<16x8xf32>
    %c0_30 = arith.constant 0 : index
    %c0_31 = arith.constant 0 : index
    %56 = vector.load %arg10[%c0_30, %c0_31] : memref<16x1280xf32, #tpu.memory_space<vmem>>, vector<16x128xf32>
    %57 = arith.mulf %56, %14 : vector<16x128xf32>
    %c0_32 = arith.constant 0 : index
    %c0_33 = arith.constant 0 : index
    %58 = vector.load %arg11[%c0_32, %c0_33] : memref<16x1280xf32, #tpu.memory_space<vmem>>, vector<16x128xf32>
    %59 = arith.mulf %58, %15 : vector<16x128xf32>
    %60 = arith.addf %57, %59 : vector<16x128xf32>
    %61 = vector.extract_strided_slice %60 {offsets = [0, 0], sizes = [16, 64], strides = [1, 1]} : vector<16x128xf32> to vector<16x64xf32>
    %62 = vector.extract_strided_slice %60 {offsets = [0, 64], sizes = [16, 64], strides = [1, 1]} : vector<16x128xf32> to vector<16x64xf32>
    %cst_34 = arith.constant dense<0.000000e+00> : vector<16x16xf32>
    %63 = tpu.matmul %61, %62, %cst_34 {dimension_numbers = #tpu.dot_dimension_numbers<[1], [1], [0], [0], [0, 0, 1, 0], [], []>} : vector<16x64xf32>, vector<16x64xf32>, vector<16x16xf32> -> vector<16x16xf32>
    %64 = vector.extract_strided_slice %63 {offsets = [0, 0], sizes = [16, 8], strides = [1, 1]} : vector<16x16xf32> to vector<16x8xf32>
    %c8_i32_35 = arith.constant 8 : i32
    %65 = vector.broadcast %c8_i32_35 : i32 to vector<16x8xi32>
    %66 = arith.cmpi sge, %16, %65 : vector<16x8xi32>
    %67 = vector.extract_strided_slice %63 {offsets = [0, 8], sizes = [16, 8], strides = [1, 1]} : vector<16x16xf32> to vector<16x8xf32>
    %68 = arith.select %66, %67, %64 : vector<16x8xi1>, vector<16x8xf32>
    %69 = arith.mulf %68, %50 : vector<16x8xf32>
    %70 = arith.addf %69, %55 : vector<16x8xf32>
    %c0_36 = arith.constant 0 : index
    %c0_37 = arith.constant 0 : index
    %71 = vector.load %arg9[%c0_36, %c0_37] : memref<16x128xf32, #tpu.memory_space<vmem>>, vector<16x8xf32>
    tpu.vector_store %arg9[%c0_36, %c0_37], %70 {strides = array<i32>} : memref<16x128xf32, #tpu.memory_space<vmem>>, vector<16x8xf32>,
    %c0_38 = arith.constant 0 : index
    %c128 = arith.constant 128 : index
    %72 = vector.load %arg10[%c0_38, %c128] : memref<16x1280xf32, #tpu.memory_space<vmem>>, vector<16x128xf32>
    %73 = arith.mulf %72, %14 : vector<16x128xf32>
    %c0_39 = arith.constant 0 : index
    %c128_40 = arith.constant 128 : index
    %74 = vector.load %arg11[%c0_39, %c128_40] : memref<16x1280xf32, #tpu.memory_space<vmem>>, vector<16x128xf32>
    %75 = arith.mulf %74, %15 : vector<16x128xf32>
    %76 = arith.addf %73, %75 : vector<16x128xf32>
    %77 = vector.extract_strided_slice %76 {offsets = [0, 0], sizes = [16, 64], strides = [1, 1]} : vector<16x128xf32> to vector<16x64xf32>
    %78 = vector.extract_strided_slice %76 {offsets = [0, 64], sizes = [16, 64], strides = [1, 1]} : vector<16x128xf32> to vector<16x64xf32>
    %cst_41 = arith.constant dense<0.000000e+00> : vector<16x16xf32>
    %79 = tpu.matmul %77, %78, %cst_41 {dimension_numbers = #tpu.dot_dimension_numbers<[1], [1], [0], [0], [0, 0, 1, 0], [], []>} : vector<16x64xf32>, vector<16x64xf32>, vector<16x16xf32> -> vector<16x16xf32>
    %80 = vector.extract_strided_slice %79 {offsets = [0, 0], sizes = [16, 8], strides = [1, 1]} : vector<16x16xf32> to vector<16x8xf32>
    %c8_i32_42 = arith.constant 8 : i32
    %81 = vector.broadcast %c8_i32_42 : i32 to vector<16x8xi32>
    %82 = arith.cmpi sge, %16, %81 : vector<16x8xi32>
    %83 = vector.extract_strided_slice %79 {offsets = [0, 8], sizes = [16, 8], strides = [1, 1]} : vector<16x16xf32> to vector<16x8xf32>
    %84 = arith.select %82, %83, %80 : vector<16x8xi1>, vector<16x8xf32>
    %85 = arith.mulf %84, %50 : vector<16x8xf32>
    %86 = arith.addf %85, %55 : vector<16x8xf32>
    %c0_43 = arith.constant 0 : index
    %c8 = arith.constant 8 : index
    %87 = vector.load %arg9[%c0_43, %c8] : memref<16x128xf32, #tpu.memory_space<vmem>>, vector<16x8xf32>
    tpu.vector_store %arg9[%c0_43, %c8], %86 {strides = array<i32>} : memref<16x128xf32, #tpu.memory_space<vmem>>, vector<16x8xf32>,
    %c0_44 = arith.constant 0 : index
    %c256 = arith.constant 256 : index
    %88 = vector.load %arg10[%c0_44, %c256] : memref<16x1280xf32, #tpu.memory_space<vmem>>, vector<16x128xf32>
    %89 = arith.mulf %88, %14 : vector<16x128xf32>
    %c0_45 = arith.constant 0 : index
    %c256_46 = arith.constant 256 : index
    %90 = vector.load %arg11[%c0_45, %c256_46] : memref<16x1280xf32, #tpu.memory_space<vmem>>, vector<16x128xf32>
    %91 = arith.mulf %90, %15 : vector<16x128xf32>
    %92 = arith.addf %89, %91 : vector<16x128xf32>
    %93 = vector.extract_strided_slice %92 {offsets = [0, 0], sizes = [16, 64], strides = [1, 1]} : vector<16x128xf32> to vector<16x64xf32>
    %94 = vector.extract_strided_slice %92 {offsets = [0, 64], sizes = [16, 64], strides = [1, 1]} : vector<16x128xf32> to vector<16x64xf32>
    %cst_47 = arith.constant dense<0.000000e+00> : vector<16x16xf32>
    %95 = tpu.matmul %93, %94, %cst_47 {dimension_numbers = #tpu.dot_dimension_numbers<[1], [1], [0], [0], [0, 0, 1, 0], [], []>} : vector<16x64xf32>, vector<16x64xf32>, vector<16x16xf32> -> vector<16x16xf32>
    %96 = vector.extract_strided_slice %95 {offsets = [0, 0], sizes = [16, 8], strides = [1, 1]} : vector<16x16xf32> to vector<16x8xf32>
    %c8_i32_48 = arith.constant 8 : i32
    %97 = vector.broadcast %c8_i32_48 : i32 to vector<16x8xi32>
    %98 = arith.cmpi sge, %16, %97 : vector<16x8xi32>
    %99 = vector.extract_strided_slice %95 {offsets = [0, 8], sizes = [16, 8], strides = [1, 1]} : vector<16x16xf32> to vector<16x8xf32>
    %100 = arith.select %98, %99, %96 : vector<16x8xi1>, vector<16x8xf32>
    %101 = arith.mulf %100, %50 : vector<16x8xf32>
    %102 = arith.addf %101, %55 : vector<16x8xf32>
    %c0_49 = arith.constant 0 : index
    %c16 = arith.constant 16 : index
    %103 = vector.load %arg9[%c0_49, %c16] : memref<16x128xf32, #tpu.memory_space<vmem>>, vector<16x8xf32>
    tpu.vector_store %arg9[%c0_49, %c16], %102 {strides = array<i32>} : memref<16x128xf32, #tpu.memory_space<vmem>>, vector<16x8xf32>,
    %c0_50 = arith.constant 0 : index
    %c384 = arith.constant 384 : index
    %104 = vector.load %arg10[%c0_50, %c384] : memref<16x1280xf32, #tpu.memory_space<vmem>>, vector<16x128xf32>
    %105 = arith.mulf %104, %14 : vector<16x128xf32>
    %c0_51 = arith.constant 0 : index
    %c384_52 = arith.constant 384 : index
    %106 = vector.load %arg11[%c0_51, %c384_52] : memref<16x1280xf32, #tpu.memory_space<vmem>>, vector<16x128xf32>
    %107 = arith.mulf %106, %15 : vector<16x128xf32>
    %108 = arith.addf %105, %107 : vector<16x128xf32>
    %109 = vector.extract_strided_slice %108 {offsets = [0, 0], sizes = [16, 64], strides = [1, 1]} : vector<16x128xf32> to vector<16x64xf32>
    %110 = vector.extract_strided_slice %108 {offsets = [0, 64], sizes = [16, 64], strides = [1, 1]} : vector<16x128xf32> to vector<16x64xf32>
    %cst_53 = arith.constant dense<0.000000e+00> : vector<16x16xf32>
    %111 = tpu.matmul %109, %110, %cst_53 {dimension_numbers = #tpu.dot_dimension_numbers<[1], [1], [0], [0], [0, 0, 1, 0], [], []>} : vector<16x64xf32>, vector<16x64xf32>, vector<16x16xf32> -> vector<16x16xf32>
    %112 = vector.extract_strided_slice %111 {offsets = [0, 0], sizes = [16, 8], strides = [1, 1]} : vector<16x16xf32> to vector<16x8xf32>
    %c8_i32_54 = arith.constant 8 : i32
    %113 = vector.broadcast %c8_i32_54 : i32 to vector<16x8xi32>
    %114 = arith.cmpi sge, %16, %113 : vector<16x8xi32>
    %115 = vector.extract_strided_slice %111 {offsets = [0, 8], sizes = [16, 8], strides = [1, 1]} : vector<16x16xf32> to vector<16x8xf32>
    %116 = arith.select %114, %115, %112 : vector<16x8xi1>, vector<16x8xf32>
    %117 = arith.mulf %116, %50 : vector<16x8xf32>
    %118 = arith.addf %117, %55 : vector<16x8xf32>
    %c0_55 = arith.constant 0 : index
    %c24 = arith.constant 24 : index
    %119 = vector.load %arg9[%c0_55, %c24] : memref<16x128xf32, #tpu.memory_space<vmem>>, vector<16x8xf32>
    tpu.vector_store %arg9[%c0_55, %c24], %118 {strides = array<i32>} : memref<16x128xf32, #tpu.memory_space<vmem>>, vector<16x8xf32>,
    %c0_56 = arith.constant 0 : index
    %c512 = arith.constant 512 : index
    %120 = vector.load %arg10[%c0_56, %c512] : memref<16x1280xf32, #tpu.memory_space<vmem>>, vector<16x128xf32>
    %121 = arith.mulf %120, %14 : vector<16x128xf32>
    %c0_57 = arith.constant 0 : index
    %c512_58 = arith.constant 512 : index
    %122 = vector.load %arg11[%c0_57, %c512_58] : memref<16x1280xf32, #tpu.memory_space<vmem>>, vector<16x128xf32>
    %123 = arith.mulf %122, %15 : vector<16x128xf32>
    %124 = arith.addf %121, %123 : vector<16x128xf32>
    %125 = vector.extract_strided_slice %124 {offsets = [0, 0], sizes = [16, 64], strides = [1, 1]} : vector<16x128xf32> to vector<16x64xf32>
    %126 = vector.extract_strided_slice %124 {offsets = [0, 64], sizes = [16, 64], strides = [1, 1]} : vector<16x128xf32> to vector<16x64xf32>
    %cst_59 = arith.constant dense<0.000000e+00> : vector<16x16xf32>
    %127 = tpu.matmul %125, %126, %cst_59 {dimension_numbers = #tpu.dot_dimension_numbers<[1], [1], [0], [0], [0, 0, 1, 0], [], []>} : vector<16x64xf32>, vector<16x64xf32>, vector<16x16xf32> -> vector<16x16xf32>
    %128 = vector.extract_strided_slice %127 {offsets = [0, 0], sizes = [16, 8], strides = [1, 1]} : vector<16x16xf32> to vector<16x8xf32>
    %c8_i32_60 = arith.constant 8 : i32
    %129 = vector.broadcast %c8_i32_60 : i32 to vector<16x8xi32>
    %130 = arith.cmpi sge, %16, %129 : vector<16x8xi32>
    %131 = vector.extract_strided_slice %127 {offsets = [0, 8], sizes = [16, 8], strides = [1, 1]} : vector<16x16xf32> to vector<16x8xf32>
    %132 = arith.select %130, %131, %128 : vector<16x8xi1>, vector<16x8xf32>
    %133 = arith.mulf %132, %50 : vector<16x8xf32>
    %134 = arith.addf %133, %55 : vector<16x8xf32>
    %c0_61 = arith.constant 0 : index
    %c32 = arith.constant 32 : index
    %135 = vector.load %arg9[%c0_61, %c32] : memref<16x128xf32, #tpu.memory_space<vmem>>, vector<16x8xf32>
    tpu.vector_store %arg9[%c0_61, %c32], %134 {strides = array<i32>} : memref<16x128xf32, #tpu.memory_space<vmem>>, vector<16x8xf32>,
    %c0_62 = arith.constant 0 : index
    %c640 = arith.constant 640 : index
    %136 = vector.load %arg10[%c0_62, %c640] : memref<16x1280xf32, #tpu.memory_space<vmem>>, vector<16x128xf32>
    %137 = arith.mulf %136, %14 : vector<16x128xf32>
    %c0_63 = arith.constant 0 : index
    %c640_64 = arith.constant 640 : index
    %138 = vector.load %arg11[%c0_63, %c640_64] : memref<16x1280xf32, #tpu.memory_space<vmem>>, vector<16x128xf32>
    %139 = arith.mulf %138, %15 : vector<16x128xf32>
    %140 = arith.addf %137, %139 : vector<16x128xf32>
    %141 = vector.extract_strided_slice %140 {offsets = [0, 0], sizes = [16, 64], strides = [1, 1]} : vector<16x128xf32> to vector<16x64xf32>
    %142 = vector.extract_strided_slice %140 {offsets = [0, 64], sizes = [16, 64], strides = [1, 1]} : vector<16x128xf32> to vector<16x64xf32>
    %cst_65 = arith.constant dense<0.000000e+00> : vector<16x16xf32>
    %143 = tpu.matmul %141, %142, %cst_65 {dimension_numbers = #tpu.dot_dimension_numbers<[1], [1], [0], [0], [0, 0, 1, 0], [], []>} : vector<16x64xf32>, vector<16x64xf32>, vector<16x16xf32> -> vector<16x16xf32>
    %144 = vector.extract_strided_slice %143 {offsets = [0, 0], sizes = [16, 8], strides = [1, 1]} : vector<16x16xf32> to vector<16x8xf32>
    %c8_i32_66 = arith.constant 8 : i32
    %145 = vector.broadcast %c8_i32_66 : i32 to vector<16x8xi32>
    %146 = arith.cmpi sge, %16, %145 : vector<16x8xi32>
    %147 = vector.extract_strided_slice %143 {offsets = [0, 8], sizes = [16, 8], strides = [1, 1]} : vector<16x16xf32> to vector<16x8xf32>
    %148 = arith.select %146, %147, %144 : vector<16x8xi1>, vector<16x8xf32>
    %149 = arith.mulf %148, %50 : vector<16x8xf32>
    %150 = arith.addf %149, %55 : vector<16x8xf32>
    %c0_67 = arith.constant 0 : index
    %c40 = arith.constant 40 : index
    %151 = vector.load %arg9[%c0_67, %c40] : memref<16x128xf32, #tpu.memory_space<vmem>>, vector<16x8xf32>
    tpu.vector_store %arg9[%c0_67, %c40], %150 {strides = array<i32>} : memref<16x128xf32, #tpu.memory_space<vmem>>, vector<16x8xf32>,
    %c0_68 = arith.constant 0 : index
    %c768 = arith.constant 768 : index
    %152 = vector.load %arg10[%c0_68, %c768] : memref<16x1280xf32, #tpu.memory_space<vmem>>, vector<16x128xf32>
    %153 = arith.mulf %152, %14 : vector<16x128xf32>
    %c0_69 = arith.constant 0 : index
    %c768_70 = arith.constant 768 : index
    %154 = vector.load %arg11[%c0_69, %c768_70] : memref<16x1280xf32, #tpu.memory_space<vmem>>, vector<16x128xf32>
    %155 = arith.mulf %154, %15 : vector<16x128xf32>
    %156 = arith.addf %153, %155 : vector<16x128xf32>
    %157 = vector.extract_strided_slice %156 {offsets = [0, 0], sizes = [16, 64], strides = [1, 1]} : vector<16x128xf32> to vector<16x64xf32>
    %158 = vector.extract_strided_slice %156 {offsets = [0, 64], sizes = [16, 64], strides = [1, 1]} : vector<16x128xf32> to vector<16x64xf32>
    %cst_71 = arith.constant dense<0.000000e+00> : vector<16x16xf32>
    %159 = tpu.matmul %157, %158, %cst_71 {dimension_numbers = #tpu.dot_dimension_numbers<[1], [1], [0], [0], [0, 0, 1, 0], [], []>} : vector<16x64xf32>, vector<16x64xf32>, vector<16x16xf32> -> vector<16x16xf32>
    %160 = vector.extract_strided_slice %159 {offsets = [0, 0], sizes = [16, 8], strides = [1, 1]} : vector<16x16xf32> to vector<16x8xf32>
    %c8_i32_72 = arith.constant 8 : i32
    %161 = vector.broadcast %c8_i32_72 : i32 to vector<16x8xi32>
    %162 = arith.cmpi sge, %16, %161 : vector<16x8xi32>
    %163 = vector.extract_strided_slice %159 {offsets = [0, 8], sizes = [16, 8], strides = [1, 1]} : vector<16x16xf32> to vector<16x8xf32>
    %164 = arith.select %162, %163, %160 : vector<16x8xi1>, vector<16x8xf32>
    %165 = arith.mulf %164, %50 : vector<16x8xf32>
    %166 = arith.addf %165, %55 : vector<16x8xf32>
    %c0_73 = arith.constant 0 : index
    %c48 = arith.constant 48 : index
    %167 = vector.load %arg9[%c0_73, %c48] : memref<16x128xf32, #tpu.memory_space<vmem>>, vector<16x8xf32>
    tpu.vector_store %arg9[%c0_73, %c48], %166 {strides = array<i32>} : memref<16x128xf32, #tpu.memory_space<vmem>>, vector<16x8xf32>,
    %c0_74 = arith.constant 0 : index
    %c896 = arith.constant 896 : index
    %168 = vector.load %arg10[%c0_74, %c896] : memref<16x1280xf32, #tpu.memory_space<vmem>>, vector<16x128xf32>
    %169 = arith.mulf %168, %14 : vector<16x128xf32>
    %c0_75 = arith.constant 0 : index
    %c896_76 = arith.constant 896 : index
    %170 = vector.load %arg11[%c0_75, %c896_76] : memref<16x1280xf32, #tpu.memory_space<vmem>>, vector<16x128xf32>
    %171 = arith.mulf %170, %15 : vector<16x128xf32>
    %172 = arith.addf %169, %171 : vector<16x128xf32>
    %173 = vector.extract_strided_slice %172 {offsets = [0, 0], sizes = [16, 64], strides = [1, 1]} : vector<16x128xf32> to vector<16x64xf32>
    %174 = vector.extract_strided_slice %172 {offsets = [0, 64], sizes = [16, 64], strides = [1, 1]} : vector<16x128xf32> to vector<16x64xf32>
    %cst_77 = arith.constant dense<0.000000e+00> : vector<16x16xf32>
    %175 = tpu.matmul %173, %174, %cst_77 {dimension_numbers = #tpu.dot_dimension_numbers<[1], [1], [0], [0], [0, 0, 1, 0], [], []>} : vector<16x64xf32>, vector<16x64xf32>, vector<16x16xf32> -> vector<16x16xf32>
    %176 = vector.extract_strided_slice %175 {offsets = [0, 0], sizes = [16, 8], strides = [1, 1]} : vector<16x16xf32> to vector<16x8xf32>
    %c8_i32_78 = arith.constant 8 : i32
    %177 = vector.broadcast %c8_i32_78 : i32 to vector<16x8xi32>
    %178 = arith.cmpi sge, %16, %177 : vector<16x8xi32>
    %179 = vector.extract_strided_slice %175 {offsets = [0, 8], sizes = [16, 8], strides = [1, 1]} : vector<16x16xf32> to vector<16x8xf32>
    %180 = arith.select %178, %179, %176 : vector<16x8xi1>, vector<16x8xf32>
    %181 = arith.mulf %180, %50 : vector<16x8xf32>
    %182 = arith.addf %181, %55 : vector<16x8xf32>
    %c0_79 = arith.constant 0 : index
    %c56 = arith.constant 56 : index
    %183 = vector.load %arg9[%c0_79, %c56] : memref<16x128xf32, #tpu.memory_space<vmem>>, vector<16x8xf32>
    tpu.vector_store %arg9[%c0_79, %c56], %182 {strides = array<i32>} : memref<16x128xf32, #tpu.memory_space<vmem>>, vector<16x8xf32>,
    %c0_80 = arith.constant 0 : index
    %c1024 = arith.constant 1024 : index
    %184 = vector.load %arg10[%c0_80, %c1024] : memref<16x1280xf32, #tpu.memory_space<vmem>>, vector<16x128xf32>
    %185 = arith.mulf %184, %14 : vector<16x128xf32>
    %c0_81 = arith.constant 0 : index
    %c1024_82 = arith.constant 1024 : index
    %186 = vector.load %arg11[%c0_81, %c1024_82] : memref<16x1280xf32, #tpu.memory_space<vmem>>, vector<16x128xf32>
    %187 = arith.mulf %186, %15 : vector<16x128xf32>
    %188 = arith.addf %185, %187 : vector<16x128xf32>
    %189 = vector.extract_strided_slice %188 {offsets = [0, 0], sizes = [16, 64], strides = [1, 1]} : vector<16x128xf32> to vector<16x64xf32>
    %190 = vector.extract_strided_slice %188 {offsets = [0, 64], sizes = [16, 64], strides = [1, 1]} : vector<16x128xf32> to vector<16x64xf32>
    %cst_83 = arith.constant dense<0.000000e+00> : vector<16x16xf32>
    %191 = tpu.matmul %189, %190, %cst_83 {dimension_numbers = #tpu.dot_dimension_numbers<[1], [1], [0], [0], [0, 0, 1, 0], [], []>} : vector<16x64xf32>, vector<16x64xf32>, vector<16x16xf32> -> vector<16x16xf32>
    %192 = vector.extract_strided_slice %191 {offsets = [0, 0], sizes = [16, 8], strides = [1, 1]} : vector<16x16xf32> to vector<16x8xf32>
    %c8_i32_84 = arith.constant 8 : i32
    %193 = vector.broadcast %c8_i32_84 : i32 to vector<16x8xi32>
    %194 = arith.cmpi sge, %16, %193 : vector<16x8xi32>
    %195 = vector.extract_strided_slice %191 {offsets = [0, 8], sizes = [16, 8], strides = [1, 1]} : vector<16x16xf32> to vector<16x8xf32>
    %196 = arith.select %194, %195, %192 : vector<16x8xi1>, vector<16x8xf32>
    %197 = arith.mulf %196, %50 : vector<16x8xf32>
    %198 = arith.addf %197, %55 : vector<16x8xf32>
    %c0_85 = arith.constant 0 : index
    %c64 = arith.constant 64 : index
    %199 = vector.load %arg9[%c0_85, %c64] : memref<16x128xf32, #tpu.memory_space<vmem>>, vector<16x8xf32>
    tpu.vector_store %arg9[%c0_85, %c64], %198 {strides = array<i32>} : memref<16x128xf32, #tpu.memory_space<vmem>>, vector<16x8xf32>,
    %c0_86 = arith.constant 0 : index
    %c1152 = arith.constant 1152 : index
    %200 = vector.load %arg10[%c0_86, %c1152] : memref<16x1280xf32, #tpu.memory_space<vmem>>, vector<16x128xf32>
    %201 = arith.mulf %200, %14 : vector<16x128xf32>
    %c0_87 = arith.constant 0 : index
    %c1152_88 = arith.constant 1152 : index
    %202 = vector.load %arg11[%c0_87, %c1152_88] : memref<16x1280xf32, #tpu.memory_space<vmem>>, vector<16x128xf32>
    %203 = arith.mulf %202, %15 : vector<16x128xf32>
    %204 = arith.addf %201, %203 : vector<16x128xf32>
    %205 = vector.extract_strided_slice %204 {offsets = [0, 0], sizes = [16, 64], strides = [1, 1]} : vector<16x128xf32> to vector<16x64xf32>
    %206 = vector.extract_strided_slice %204 {offsets = [0, 64], sizes = [16, 64], strides = [1, 1]} : vector<16x128xf32> to vector<16x64xf32>
    %cst_89 = arith.constant dense<0.000000e+00> : vector<16x16xf32>
    %207 = tpu.matmul %205, %206, %cst_89 {dimension_numbers = #tpu.dot_dimension_numbers<[1], [1], [0], [0], [0, 0, 1, 0], [], []>} : vector<16x64xf32>, vector<16x64xf32>, vector<16x16xf32> -> vector<16x16xf32>
    %208 = vector.extract_strided_slice %207 {offsets = [0, 0], sizes = [16, 8], strides = [1, 1]} : vector<16x16xf32> to vector<16x8xf32>
    %c8_i32_90 = arith.constant 8 : i32
    %209 = vector.broadcast %c8_i32_90 : i32 to vector<16x8xi32>
    %210 = arith.cmpi sge, %16, %209 : vector<16x8xi32>
    %211 = vector.extract_strided_slice %207 {offsets = [0, 8], sizes = [16, 8], strides = [1, 1]} : vector<16x16xf32> to vector<16x8xf32>
    %212 = arith.select %210, %211, %208 : vector<16x8xi1>, vector<16x8xf32>
    %213 = arith.mulf %212, %50 : vector<16x8xf32>
    %214 = arith.addf %213, %55 : vector<16x8xf32>
    %c0_91 = arith.constant 0 : index
    %c72 = arith.constant 72 : index
    %215 = vector.load %arg9[%c0_91, %c72] : memref<16x128xf32, #tpu.memory_space<vmem>>, vector<16x8xf32>
    tpu.vector_store %arg9[%c0_91, %c72], %214 {strides = array<i32>} : memref<16x128xf32, #tpu.memory_space<vmem>>, vector<16x8xf32>,
    %cst_92 = arith.constant 0.000000e+00 : f32
    %216 = vector.broadcast %cst_92 : f32 to vector<16x48xf32>
    %c0_93 = arith.constant 0 : index
    %c80 = arith.constant 80 : index
    %217 = vector.load %arg9[%c0_93, %c80] : memref<16x128xf32, #tpu.memory_space<vmem>>, vector<16x48xf32>
    tpu.vector_store %arg9[%c0_93, %c80], %216 {strides = array<i32>} : memref<16x128xf32, #tpu.memory_space<vmem>>, vector<16x48xf32>,
    return
  }
  func.func @transform_0(%arg0: i32) -> (i32, i32) {
    %c0_i32 = arith.constant 0 : i32
    %c0_i32_0 = arith.constant 0 : i32
    return %arg0, %c0_i32 : i32, i32
  }
  func.func @transform_1(%arg0: i32) -> (i32, i32) {
    %c0_i32 = arith.constant 0 : i32
    %c0_i32_0 = arith.constant 0 : i32
    %c0_i32_1 = arith.constant 0 : i32
    return %c0_i32, %c0_i32_0 : i32, i32
  }
  func.func @transform_2(%arg0: i32) -> (i32, i32) {
    %c0_i32 = arith.constant 0 : i32
    %c0_i32_0 = arith.constant 0 : i32
    %c0_i32_1 = arith.constant 0 : i32
    return %c0_i32, %c0_i32_0 : i32, i32
  }
  func.func @transform_3(%arg0: i32) -> (i32, i32) {
    %c0_i32 = arith.constant 0 : i32
    %c0_i32_0 = arith.constant 0 : i32
    %c0_i32_1 = arith.constant 0 : i32
    return %c0_i32, %c0_i32_0 : i32, i32
  }
  func.func @transform_4(%arg0: i32) -> (i32, i32) {
    %c0_i32 = arith.constant 0 : i32
    %c0_i32_0 = arith.constant 0 : i32
    %c0_i32_1 = arith.constant 0 : i32
    return %c0_i32, %c0_i32_0 : i32, i32
  }
  func.func @transform_5(%arg0: i32) -> (i32, i32) {
    %c0_i32 = arith.constant 0 : i32
    %c0_i32_0 = arith.constant 0 : i32
    %c0_i32_1 = arith.constant 0 : i32
    return %c0_i32, %c0_i32_0 : i32, i32
  }
  func.func @transform_6(%arg0: i32) -> (i32, i32) {
    %c0_i32 = arith.constant 0 : i32
    %c0_i32_0 = arith.constant 0 : i32
    %c0_i32_1 = arith.constant 0 : i32
    return %c0_i32, %c0_i32_0 : i32, i32
  }
  func.func @transform_7(%arg0: i32) -> (i32, i32, i32) {
    %c0_i32 = arith.constant 0 : i32
    %c0_i32_0 = arith.constant 0 : i32
    %c0_i32_1 = arith.constant 0 : i32
    return %arg0, %c0_i32, %c0_i32_0 : i32, i32, i32
  }
  func.func @transform_8(%arg0: i32) -> (i32, i32) {
    %c0_i32 = arith.constant 0 : i32
    %c0_i32_0 = arith.constant 0 : i32
    return %arg0, %c0_i32 : i32, i32
  }
}

</mosaic_0001>

<bundles_post_ra>
// kernel: tpu_custom_call.1
= control target key start
LH: loop header
LB: loop body
LE: loop exit
PB: predicated region body
PF: predicated region fallthrough
CT: control target
= control target key end

     0   :  { %13 = vsyncpa [#allocation5], 0  ;;  %s3414_s0 = inlined_call_operand.hbm [shape: bf16[16,32], index: 0, kind: input, shape index: {}]   ;;  %s3415_s1 = inlined_call_operand.hbm [shape: bf16[32,1280], index: 1, kind: input, shape index: {}]   ;;  %s3416_s2 = inlined_call_operand.hbm [shape: bf16[32,1280], index: 2, kind: input, shape index: {}]   ;;  %s3417_s3 = inlined_call_operand.hbm [shape: f32[1,1280], index: 3, kind: input, shape index: {}]   ;;  %s3418_s4 = inlined_call_operand.hbm [shape: f32[1,1280], index: 4, kind: input, shape index: {}]   ;;  %s3419_s5 = inlined_call_operand.vmem [shape: f32[16,128], index: 5, kind: input, shape index: {}]   ;;  %s3420_s6 = inlined_call_operand.hbm [shape: f32[16,128], index: 6, kind: input, shape index: {}]   ;;  %s3421_s7 = inlined_call_operand.vmem [shape: f32[2,1,8], index: 7, kind: input, shape index: {}]   ;;  %s3422_s8 = inlined_call_operand.hbm [shape: f32[16,128], index: 8, kind: output, shape index: {}]  }
   0x1   :  { %14 = vsyncpa [#allocation8], 0 }
   0x2   :  { %15 = vsyncpa [#allocation11], 0 }
   0x3   :  { %16 = vsyncpa [#allocation14], 0 }
   0x4   :  { %17 = vsyncpa [#allocation6], 0  ;;  %s2850_s27 = smov [#allocation7]   ;;  %s2686_s9 = scalar_lea.hbm %s3415_s1, 2560 }
   0x5   :  { %s35_s28 = sshll.u32 %s2850_s27, 4  ;;  %p2687_p0 = scmp.ne.s32.totalorder %s3415_s1, %s2686_s9  ;;  %s36_s28 = int_to_ptr.vmem [resolvable:$true] %s35_s28 }
   0x6   :  { %p2690_p1 = scmp.lt.u32.totalorder %s2686_s9, %s3415_s1 }
   0x8   :  { %p2692_p2 = pnand %p2690_p1, %p2687_p0 }
   0xa   :  { %2695 = shalt.err (!%p2692_p2)
}
   0xb   :  { %s2696_s14 = scalar_lea.vmem %s36_s28, 2560  ;;  %p2701_p4 = scmp.lt.s32.totalorder %s36_s28, %s36_s28 }
   0xc   :  { %p2697_p3 = scmp.ne.s32.totalorder %s36_s28, %s2696_s14  ;;  %p2702_p5 = scmp.lt.s32.totalorder %s2696_s14, %s2696_s14 }
   0xe   :  { %p2703_p6 = por %p2702_p5, %p2701_p4 }
  0x10   :  { %p2704_p7 = pnand %p2703_p6, %p2697_p3 }
  0x12   :  { %2707 = shalt.err (!%p2704_p7)
}
  0x13   :  { %s2851_s15 = smov 640   ;;  %s2852_s16 = smov 40  }
  0x14   :  { %41 = dma.hbm_to_vmem [thread:$0]  %s3415_s1, 2560, %s36_s28, [#allocation8], %s2851_s15, %s2851_s15, %s2852_s16  }
  0x15   :  { %s2853_s19 = smov [#allocation10]   ;;  %s2854_s21 = smov [#allocation4]  }
  0x16   :  { %s60_s20 = sshll.u32 %s2853_s19, 4  ;;  %s23_s22 = sshll.u32 %s2854_s21, 4  ;;  %s61_s20 = int_to_ptr.vmem [resolvable:$true] %s60_s20  ;;  %s24_s22 = int_to_ptr.vmem [resolvable:$true] %s23_s22 }
  0x17   :  { %s2708_s25 = scalar_lea.hbm %s3417_s3, 160 }
  0x18   :  { %p2709_p8 = scmp.ne.s32.totalorder %s3417_s3, %s2708_s25  ;;  %p2712_p9 = scmp.lt.u32.totalorder %s2708_s25, %s3417_s3 }
  0x1a   :  { %p2714_p10 = pnand %p2712_p9, %p2709_p8 }
  0x1c   :  { %2717 = shalt.err (!%p2714_p10)
}
  0x1d   :  { %s2718_s1 = scalar_lea.vmem %s61_s20, 160  ;;  %p2723_p12 = scmp.lt.s32.totalorder %s61_s20, %s61_s20 }
  0x1e   :  { %p2719_p11 = scmp.ne.s32.totalorder %s61_s20, %s2718_s1  ;;  %p2724_p13 = scmp.lt.s32.totalorder %s2718_s1, %s2718_s1 }
  0x20   :  { %p2725_p0 = por %p2724_p13, %p2723_p12 }
  0x22   :  { %p2726_p1 = pnand %p2725_p0, %p2719_p11 }
  0x24   :  { %2729 = shalt.err (!%p2726_p1)
}
  0x25   :  { %63 = dma.hbm_to_vmem [thread:$0]  %s3417_s3, 160, %s61_s20, [#allocation11]  }
  0x26   :  { %s2730_s12 = scalar_lea.hbm %s3414_s0, 128 }
  0x27   :  { %p2731_p2 = scmp.ne.s32.totalorder %s3414_s0, %s2730_s12  ;;  %p2734_p3 = scmp.lt.u32.totalorder %s2730_s12, %s3414_s0 }
  0x29   :  { %p2736_p4 = pnand %p2734_p3, %p2731_p2 }
  0x2b   :  { %2739 = shalt.err (!%p2736_p4)
}
  0x2c   :  { %s2740_s19 = scalar_lea.vmem %s24_s22, 128  ;;  %p2745_p6 = scmp.lt.s32.totalorder %s24_s22, %s24_s22 }
  0x2d   :  { %p2741_p5 = scmp.ne.s32.totalorder %s24_s22, %s2740_s19  ;;  %p2746_p7 = scmp.lt.s32.totalorder %s2740_s19, %s2740_s19 }
  0x2f   :  { %p2747_p8 = por %p2746_p7, %p2745_p6 }
  0x31   :  { %p2748_p9 = pnand %p2747_p8, %p2741_p5 }
  0x33   :  { %2751 = shalt.err (!%p2748_p9)
}
  0x34   :  { %s2855_s3 = smov 64   ;;  %s2856_s20 = smov 4  }
  0x35   :  { %29 = dma.hbm_to_vmem [thread:$0]  %s3414_s0, 128, %s24_s22, [#allocation5], %s2855_s3, %s2855_s3, %s2856_s20  }
  0x36   :  { %s2857_s24 = smov [#allocation9]   ;;  %s2858_s26 = smov [#allocation12]  }
  0x37   :  { %s47_s25 = sshll.u32 %s2857_s24, 4  ;;  %s70_s27 = sshll.u32 %s2858_s26, 4  ;;  %s48_s25 = int_to_ptr.vmem [resolvable:$true] %s47_s25  ;;  %s71_s27 = int_to_ptr.vmem [resolvable:$true] %s70_s27 }
  0x38   :  { %s2752_s1 = scalar_lea.hbm %s3416_s2, 2560 }
  0x39   :  { %p2753_p10 = scmp.ne.s32.totalorder %s3416_s2, %s2752_s1  ;;  %p2756_p11 = scmp.lt.u32.totalorder %s2752_s1, %s3416_s2 }
  0x3b   :  { %p2758_p12 = pnand %p2756_p11, %p2753_p10 }
  0x3d   :  { %2761 = shalt.err (!%p2758_p12)
}
  0x3e   :  { %s2762_s0 = scalar_lea.vmem %s48_s25, 2560  ;;  %p2767_p0 = scmp.lt.s32.totalorder %s48_s25, %s48_s25 }
  0x3f   :  { %p2763_p13 = scmp.ne.s32.totalorder %s48_s25, %s2762_s0  ;;  %p2768_p1 = scmp.lt.s32.totalorder %s2762_s0, %s2762_s0 }
  0x41   :  { %p2769_p2 = por %p2768_p1, %p2767_p0 }
  0x43   :  { %p2770_p3 = pnand %p2769_p2, %p2763_p13 }
  0x45   :  { %2773 = shalt.err (!%p2770_p3)
}
  0x46   :  { %53 = dma.hbm_to_vmem [thread:$0]  %s3416_s2, 2560, %s48_s25, [#allocation8], %s2851_s15, %s2851_s15, %s2852_s16  }
  0x47   :  { %s2774_s17 = scalar_lea.hbm %s3418_s4, 160 }
  0x48   :  { %p2775_p4 = scmp.ne.s32.totalorder %s3418_s4, %s2774_s17  ;;  %p2778_p5 = scmp.lt.u32.totalorder %s2774_s17, %s3418_s4 }
  0x4a   :  { %p2780_p6 = pnand %p2778_p5, %p2775_p4 }
  0x4c   :  { %2783 = shalt.err (!%p2780_p6)
}
  0x4d   :  { %s2784_s23 = scalar_lea.vmem %s71_s27, 160  ;;  %p2789_p8 = scmp.lt.s32.totalorder %s71_s27, %s71_s27 }
  0x4e   :  { %p2785_p7 = scmp.ne.s32.totalorder %s71_s27, %s2784_s23  ;;  %p2790_p9 = scmp.lt.s32.totalorder %s2784_s23, %s2784_s23 }
  0x50   :  { %p2791_p10 = por %p2790_p9, %p2789_p8 }
  0x52   :  { %p2792_p11 = pnand %p2791_p10, %p2785_p7 }
  0x54   :  { %2795 = shalt.err (!%p2792_p11)
}
  0x55   :  { %73 = dma.hbm_to_vmem [thread:$0]  %s3418_s4, 160, %s71_s27, [#allocation11]  }
  0x56   :  { %s2859_s24 = smov [#allocation13]   ;;  %s2796_s30 = scalar_lea.hbm %s3420_s6, 256 }
  0x57   :  { %s81_s25 = sshll.u32 %s2859_s24, 4  ;;  %p2797_p12 = scmp.ne.s32.totalorder %s3420_s6, %s2796_s30  ;;  %s82_s25 = int_to_ptr.vmem [resolvable:$true] %s81_s25 }
  0x58   :  { %p2800_p13 = scmp.lt.u32.totalorder %s2796_s30, %s3420_s6 }
  0x5a   :  { %p2802_p0 = pnand %p2800_p13, %p2797_p12 }
  0x5c   :  { %2805 = shalt.err (!%p2802_p0)
}
  0x5d   :  { %s2806_s11 = scalar_lea.vmem %s82_s25, 256  ;;  %p2811_p2 = scmp.lt.s32.totalorder %s82_s25, %s82_s25 }
  0x5e   :  { %p2807_p1 = scmp.ne.s32.totalorder %s82_s25, %s2806_s11  ;;  %p2812_p3 = scmp.lt.s32.totalorder %s2806_s11, %s2806_s11 }
  0x60   :  { %p2813_p4 = por %p2812_p3, %p2811_p2 }
  0x62   :  { %p2814_p5 = pnand %p2813_p4, %p2807_p1 }
  0x64   :  { %2817 = shalt.err (!%p2814_p5)
}
  0x65   :  { %s2860_s4 = smov 128   ;;  %s2861_s27 = smov 8  }
  0x66   :  { %87 = dma.hbm_to_vmem [thread:$0]  %s3420_s6, 256, %s82_s25, [#allocation14], %s2860_s4, %s2860_s4, %s2861_s27  }
  0x67   :  { %2840 = dma.done.wait [#allocation5], 128  }
  0x68   :  { %2841 = vsyncadd [#allocation5], 4294967168 }
  0x69   :  { %2842 = dma.done.wait [#allocation8], 5120  }
  0x6a   :  { %2843 = vsyncadd [#allocation8], 4294962176 }
  0x6b   :  { %2844 = dma.done.wait [#allocation11], 320  }
  0x6c   :  { %2845 = vsyncadd [#allocation11], 4294966976 }
  0x6d   :  { %2846 = dma.done.wait [#allocation14], 256  }
  0x6e   :  { %2847 = vsyncadd [#allocation14], 4294967040  ;;  %v2862_v0 = vmov 0   ;;  %v2624_v1 = vld [vmem:[#allocation7 + $0x4] ss:$40 sps:$4 sm:$0xff]   ;;  %v2636_v9 = vld [vmem:[#allocation4] sm:$0xff]   ;;  %v135_v43 = vlaneseq }
  0x6f   :  { %326 = vmatprep.mubr.bf16.mxu0 %v2862_v0  ;;  %369 = vmatprep.mubr.bf16.mxu1 %v2862_v0  ;;  %v2626_v2 = vld [vmem:[#allocation7 + $0xc] ss:$40 sps:$4 sm:$0xff]   ;;  %v2628_v3 = vld [vmem:[#allocation7] ss:$40 sps:$4 sm:$0xff]   ;;  %v2632_v6 = vld [vmem:[#allocation7 + $0x5c] ss:$40 sps:$4 sm:$0xff]  }
  0x70   :  { %294 = vmatprep.subr.bf16.mxu0 %v2624_v1  ;;  %v2629_v4 = vld [vmem:[#allocation7 + $0x8] ss:$40 sps:$4 sm:$0xff]   ;;  %337 = vmatprep.subr.bf16.mxu1 %v2626_v2  ;;  %v2630_v5 = vld [vmem:[#allocation7 + $0x54] ss:$40 sps:$4 sm:$0xff]   ;;  %v2635_v8 = vld [vmem:[#allocation7 + $0x58] ss:$40 sps:$4 sm:$0xff]  }
  0x71   :  { %295 = vmatpush1.bf16.msra.mxu0 %v2628_v3  ;;  %338 = vmatpush1.bf16.msra.mxu1 %v2629_v4  ;;  %v2634_v7 = vld [vmem:[#allocation7 + $0x50] ss:$40 sps:$4 sm:$0xff]   ;;  %v2639_v11 = vld [vmem:[#allocation7 + $0x14] ss:$40 sps:$4 sm:$0xff]   ;;  %vm290_vm0 = vcmask 261120   ;;  %v3020_v44 = vshrl.u32 %v135_v43, 7 }
  0x72   :  { %296 = vmatprep.subr.bf16.mxu0 %v2630_v5  ;;  %339 = vmatprep.subr.bf16.mxu1 %v2632_v6  ;;  %v2637_v10 = vld [vmem:[#allocation7 + $0x10] ss:$40 sps:$4 sm:$0xff]   ;;  %v2642_v13 = vld [vmem:[#allocation7 + $0x1c] ss:$40 sps:$4 sm:$0xff]   ;;  %v2648_v15 = vld [vmem:[#allocation7 + $0x6c] ss:$40 sps:$4 sm:$0xff]  }
  0x73   :  { %v2640_v12 = vld [vmem:[#allocation7 + $0x18] ss:$40 sps:$4 sm:$0xff]   ;;  %v2645_v14 = vld [vmem:[#allocation7 + $0x64] ss:$40 sps:$4 sm:$0xff]   ;;  %v2646_v17 = vld [vmem:[#allocation7 + $0x68] ss:$40 sps:$4 sm:$0xff]  }
  0x74   :  { %v2643_v16 = vld [vmem:[#allocation7 + $0x60] ss:$40 sps:$4 sm:$0xff]   ;;  %v2651_v18 = vld [vmem:[#allocation7 + $0x24] ss:$40 sps:$4 sm:$0xff]   ;;  %v2657_v22 = vld [vmem:[#allocation7 + $0x74] ss:$40 sps:$4 sm:$0xff]  }
  0x75   :  { %297 = vmatpush1.bf16.msra.mxu0 %v2634_v7  ;;  %340 = vmatpush1.bf16.msra.mxu1 %v2635_v8  ;;  %v2654_v19 = vld [vmem:[#allocation9 + $0x4] ss:$40 sps:$4 sm:$0xff]   ;;  %v2649_v20 = vld [vmem:[#allocation7 + $0x20] ss:$40 sps:$4 sm:$0xff]   ;;  %v2660_v23 = vld [vmem:[#allocation9 + $0x54] ss:$40 sps:$4 sm:$0xff]  }
  0x76   :  { %380 = vmatprep.subr.bf16.mxu0 %v2639_v11  ;;  %423 = vmatprep.subr.bf16.mxu1 %v2642_v13  ;;  %v2652_v21 = vld [vmem:[#allocation9] ss:$40 sps:$4 sm:$0xff]   ;;  %v2655_v24 = vld [vmem:[#allocation7 + $0x70] ss:$40 sps:$4 sm:$0xff]   ;;  %v2664_v26 = vld [vmem:[#allocation9 + $0xc] ss:$40 sps:$4 sm:$0xff]  }
  0x77   :  { %v2658_v25 = vld [vmem:[#allocation9 + $0x50] ss:$40 sps:$4 sm:$0xff]   ;;  %v2667_v27 = vld [vmem:[#allocation9 + $0x14] ss:$40 sps:$4 sm:$0xff]   ;;  %v2673_v32 = vld [vmem:[#allocation9 + $0x64] ss:$40 sps:$4 sm:$0xff]  }
  0x78   :  { %2306 = vmatmul.mubr.msk.bf16.vlgmr.msra.gmra.mrb[0].mxu0 %vm290_vm0, %v2636_v9  ;;  %2307 = vmatmul.mubr.msk.bf16.vlgmr.msra.gmra.mrb[0].mxu1 %vm290_vm0, %v2636_v9  ;;  %v2661_v28 = vld [vmem:[#allocation4] sm:$0xff]   ;;  %v2662_v29 = vld [vmem:[#allocation9 + $0x8] ss:$40 sps:$4 sm:$0xff]   ;;  %v2679_v36 = vld [vmem:[#allocation9 + $0x24] ss:$40 sps:$4 sm:$0xff]   ;;  %v137_v51 = vsub.s32 0, %v3020_v44 }
  0x79   :  { %381 = vmatpush1.bf16.msra.mxu0 %v2637_v10  ;;  %424 = vmatpush1.bf16.msra.mxu1 %v2640_v12  ;;  %v2665_v30 = vld [vmem:[#allocation9 + $0x10] ss:$40 sps:$4 sm:$0xff]   ;;  %v2670_v31 = vld [vmem:[#allocation9 + $0x5c] ss:$40 sps:$4 sm:$0xff]   ;;  %v2671_v34 = vld [vmem:[#allocation9 + $0x60] ss:$40 sps:$4 sm:$0xff]  }
  0x7a   :  { %382 = vmatprep.subr.bf16.mxu0 %v2645_v14  ;;  %425 = vmatprep.subr.bf16.mxu1 %v2648_v15  ;;  %v2668_v33 = vld [vmem:[#allocation9 + $0x58] ss:$40 sps:$4 sm:$0xff]   ;;  %v2676_v35 = vld [vmem:[#allocation9 + $0x1c] ss:$40 sps:$4 sm:$0xff]   ;;  %v2682_v39 = vld [vmem:[#allocation9 + $0x6c] ss:$40 sps:$4 sm:$0xff]  }
  0x7b   :  { %412 = vmatprep.mubr.bf16.mxu0 %v2862_v0  ;;  %455 = vmatprep.mubr.bf16.mxu1 %v2862_v0  ;;  %v2674_v37 = vld [vmem:[#allocation9 + $0x18] ss:$40 sps:$4 sm:$0xff]   ;;  %v2685_v40 = vld [vmem:[#allocation9 + $0x74] ss:$40 sps:$4 sm:$0xff]   ;;  %v2680_v41 = vld [vmem:[#allocation9 + $0x68] ss:$40 sps:$4 sm:$0xff]  }
  0x7c   :  { %v2677_v38 = vld [vmem:[#allocation9 + $0x20] ss:$40 sps:$4 sm:$0xff]   ;;  %v2683_v42 = vld [vmem:[#allocation9 + $0x70] ss:$40 sps:$4 sm:$0xff]   ;;  %v145_v52 = vsub.s32 2, %v3020_v44  ;;  %v141_v56 = vsub.s32 1, %v3020_v44 }
  0x7d   :  { %383 = vmatpush1.bf16.msra.mxu0 %v2643_v16  ;;  %426 = vmatpush1.bf16.msra.mxu1 %v2646_v17  ;;  %v131_v55 = vld [vmem:[#allocation10] sm:$0xff]  ;;  %v149_v57 = vsub.s32 3, %v3020_v44  ;;  %v153_v58 = vsub.s32 4, %v3020_v44  ;;  %v161_v59 = vsub.s32 6, %v3020_v44  ;;  %v157_v60 = vsub.s32 5, %v3020_v44  ;;  %v551_v1 = vld [vmem:[#allocation12] sm:$0xff] }
  0x7e   :  { %466 = vmatprep.subr.bf16.mxu0 %v2651_v18  ;;  %713 = vmatprep.subr.bf16.mxu1 %v2654_v19  ;;  %v165_v61 = vsub.s32 7, %v3020_v44  ;;  %v138_v62 = vrot.slane %v131_v55, %v137_v51  ;;  %v146_v63 = vrot.slane %v131_v55, %v145_v52  ;;  %v142_v2 = vrot.slane %v131_v55, %v141_v56  ;;  %s2865_s20 = smov 16   ;;  %s2866_s21 = smov 24  }
  0x7f   :  { %v150_v3 = vrot.slane %v131_v55, %v149_v57  ;;  %v154_v6 = vrot.slane %v131_v55, %v153_v58  ;;  %v162_v7 = vrot.slane %v131_v55, %v161_v59  ;;  %v158_v10 = vrot.slane %v131_v55, %v157_v60  ;;  %s2867_s23 = smov 32   ;;  %s2868_s2 = smov 48  }
  0x80   :  { %2308 = vmatmul.mubr.msk.bf16.vlgmr.msra.gmra.mrb[4].mxu0 %vm290_vm0, %v2636_v9  ;;  %2309 = vmatmul.mubr.msk.bf16.vlgmr.msra.gmra.mrb[4].mxu1 %vm290_vm0, %v2636_v9  ;;  %v3030_v11 = vrot.slane %v131_v55, %v165_v61  ;;  %v558_v15 = vrot.slane %v551_v1, %v137_v51  ;;  %vm1029_vm1 = vcmask 523264   ;;  %s2869_s15 = smov 56   ;;  %vm1151_vm5 = vcmask 64512  }
  0x81   :  { %467 = vmatpush1.bf16.msra.mxu0 %v2649_v20  ;;  %714 = vmatpush1.bf16.msra.mxu1 %v2652_v21  ;;  %v562_v21 = vrot.slane %v551_v1, %v141_v56  ;;  %vm3235_vm3 = vmpackc.low %vm1029_vm1, %vm1029_vm1  ;;  %vm1267_vm6 = vcmask 130112   ;;  %vm1391_vm7 = vcmask 195712   ;;  %vm1515_vm8 = vcmask 261312  }
  0x82   :  { %468 = vmatprep.subr.bf16.mxu0 %v2657_v22  ;;  %715 = vmatprep.subr.bf16.mxu1 %v2660_v23  ;;  %v552_v22 = vld [vmem:[#allocation12 + $0x8] sm:$0x3]  ;;  %v3039_v23 = vld [vmem:[%s3419_s5] sm:$0xff]  ;;  %vm1639_vm9 = vcmask 326912   ;;  %vm1763_vm10 = vcmask 392512   ;;  %vm1887_vm11 = vcmask 458112  }
  0x83   :  { %498 = vmatprep.mubr.bf16.mxu0 %v2862_v0  ;;  %745 = vmatprep.mubr.bf16.mxu1 %v2862_v0  ;;  %vm2011_vm12 = vcmask 523712   ;;  %vm2135_vm13 = vcmask 589312   ;;  %vm2259_vm14 = vcmask 654912   ;;  %vm2262_vm15 = vcmask 1048192  }
  0x85   :  { %469 = vmatpush1.bf16.msra.mxu0 %v2655_v24  ;;  %716 = vmatpush1.bf16.msra.mxu1 %v2658_v25 }
  0x86   :  { %756 = vmatprep.subr.bf16.mxu0 %v2664_v26  ;;  %799 = vmatprep.subr.bf16.mxu1 %v2667_v27  ;;  %v3044_v27 = vld [vmem:[%s3419_s5 + $0x8] sm:$0xff] }
  0x88   :  { %2310 = vmatmul.mubr.msk.bf16.vlgmr.msra.gmra.mrb[8].mxu0 %vm290_vm0, %v2636_v9  ;;  %2332 = vmatmul.mubr.msk.bf16.vlgmr.msra.gmra.mrb[8].mxu1 %vm290_vm0, %v2661_v28 }
  0x89   :  { %757 = vmatpush1.bf16.msra.mxu0 %v2662_v29  ;;  %800 = vmatpush1.bf16.msra.mxu1 %v2665_v30  ;;  %v3046_v29 = vrot.slane %v551_v1, %v145_v52  ;;  %v3048_v30 = vrot.slane %v551_v1, %v153_v58 }
  0x8a   :  { %758 = vmatprep.subr.bf16.mxu0 %v2670_v31  ;;  %801 = vmatprep.subr.bf16.mxu1 %v2673_v32  ;;  %v3050_v31 = vrot.slane %v551_v1, %v149_v57 }
  0x8b   :  { %788 = vmatprep.mubr.bf16.mxu0 %v2862_v0  ;;  %831 = vmatprep.mubr.bf16.mxu1 %v2862_v0 }
  0x8d   :  { %759 = vmatpush1.bf16.msra.mxu0 %v2668_v33  ;;  %802 = vmatpush1.bf16.msra.mxu1 %v2671_v34  ;;  %v3052_v33 = vrot.slane %v551_v1, %v157_v60  ;;  %v3054_v34 = vrot.slane %v551_v1, %v161_v59 }
  0x8e   :  { %842 = vmatprep.subr.bf16.mxu0 %v2676_v35  ;;  %885 = vmatprep.subr.bf16.mxu1 %v2679_v36  ;;  %v3056_v35 = vrot.slane %v552_v22, %v137_v51 }
  0x90   :  { %2333 = vmatmul.mubr.msk.bf16.vlgmr.msra.gmra.mrb[12].mxu0 %vm290_vm0, %v2661_v28  ;;  %2334 = vmatmul.mubr.msk.bf16.vlgmr.msra.gmra.mrb[12].mxu1 %vm290_vm0, %v2661_v28 }
  0x91   :  { %843 = vmatpush1.bf16.msra.mxu0 %v2674_v37  ;;  %886 = vmatpush1.bf16.msra.mxu1 %v2677_v38  ;;  %v3062_v38 = vrot.slane %v551_v1, %v165_v61  ;;  %v3078_v61 = vld [vmem:[#allocation13 + $0x8] sm:$0xff] }
  0x92   :  { %844 = vmatprep.subr.bf16.mxu0 %v2682_v39  ;;  %887 = vmatprep.subr.bf16.mxu1 %v2685_v40  ;;  %v3064_v39 = vrot.slane %v552_v22, %v141_v56 }
  0x93   :  { %874 = vmatprep.mubr.bf16.mxu0 %v2862_v0  ;;  %917 = vmatprep.mubr.bf16.mxu1 %v2862_v0  ;;  %v132_v0 = vld [vmem:[#allocation10 + $0x8] sm:$0x3] }
  0x94   :  { %v3032_v14 = vrot.slane %v132_v0, %v137_v51  ;;  %v3034_v20 = vrot.slane %v132_v0, %v141_v56 }
  0x95   :  { %845 = vmatpush1.bf16.msra.mxu0 %v2680_v41  ;;  %888 = vmatpush1.bf16.msra.mxu1 %v2683_v42 }
  0x98   :  { %2335 = vmatmul.mubr.msk.bf16.vlgmr.msra.gmra.mrb[16].mxu0 %vm290_vm0, %v2661_v28  ;;  %2336 = vmatmul.mubr.msk.bf16.vlgmr.msra.gmra.mrb[16].mxu1 %vm290_vm0, %v2661_v28 }
 0x14b   :  { %v328_v45 = vpop.f32.mrb[0].mxu0  ;;  %v371_v46 = vpop.f32.mrb[0].mxu1 }
 0x14c   :  { %v330_v47 = vpop.f32.mrb[1].mxu0  ;;  %v373_v48 = vpop.f32.mrb[1].mxu1  ;;  %v329_v16 = vadd.f32 %v328_v45, %v138_v62  ;;  %v372_v17 = vadd.f32 %v371_v46, %v146_v63 }
 0x14d   :  { %v332_v49 = vpop.f32.mrb[2].mxu0  ;;  %v375_v50 = vpop.f32.mrb[2].mxu1  ;;  %v331_v24 = vadd.f32 %v330_v47, %v142_v2  ;;  %v374_v25 = vadd.f32 %v373_v48, %v150_v3  ;;  %v3071_v48 = vld [vmem:[#allocation13] sm:$0xff] }
 0x14e   :  { %v334_v53 = vpop.f32.mrb[3].mxu0  ;;  %v377_v54 = vpop.f32.mrb[3].mxu1  ;;  %v333_v26 = vadd.f32 %v332_v49, %v138_v62  ;;  %v376_v28 = vadd.f32 %v375_v50, %v146_v63  ;;  %v1015_v36 = vmul.f32 %v3039_v23, %v329_v16  ;;  %v3060_v37 = vmul.f32 %v3039_v23, %v372_v17 }
 0x14f   :  { %v335_v32 = vadd.f32 %v334_v53, %v142_v2  ;;  %v1156_v40 = vmul.f32 %v3039_v23, %v331_v24  ;;  %v3068_v41 = vmul.f32 %v3039_v23, %v374_v25  ;;  %v378_v45 = vadd.f32 %v377_v54, %v150_v3 }
 0x150   :  { %v1016_v42 = vmul.f32 %v3044_v27, %v333_v26  ;;  %v3074_v49 = vmul.f32 %v3044_v27, %v376_v28 }
 0x151   :  { %v1157_v56 = vmul.f32 %v3044_v27, %v335_v32 }
 0x153   :  { %v414_v4 = vpop.f32.mrb[4].mxu0  ;;  %v457_v5 = vpop.f32.mrb[4].mxu1 }
 0x154   :  { %v416_v8 = vpop.f32.mrb[5].mxu0  ;;  %v459_v9 = vpop.f32.mrb[5].mxu1  ;;  %v415_v50 = vadd.f32 %v414_v4, %v154_v6  ;;  %v458_v51 = vadd.f32 %v457_v5, %v162_v7  ;;  %v3082_v4 = vmul.f32 %v3044_v27, %v378_v45 }
 0x155   :  { %v418_v12 = vpop.f32.mrb[6].mxu0  ;;  %v461_v13 = vpop.f32.mrb[6].mxu1  ;;  %v417_v57 = vadd.f32 %v416_v8, %v158_v10  ;;  %v460_v58 = vadd.f32 %v459_v9, %v3030_v11 }
 0x156   :  { %v420_v18 = vpop.f32.mrb[7].mxu0  ;;  %v463_v19 = vpop.f32.mrb[7].mxu1  ;;  %v419_v62 = vadd.f32 %v418_v12, %v154_v6  ;;  %v462_v63 = vadd.f32 %v461_v13, %v162_v7  ;;  %v1520_v9 = vmul.f32 %v3039_v23, %v415_v50  ;;  %v3087_v17 = vmul.f32 %v3039_v23, %v458_v51 }
 0x157   :  { %v421_v5 = vadd.f32 %v420_v18, %v158_v10  ;;  %v1644_v7 = vmul.f32 %v3039_v23, %v417_v57  ;;  %v3092_v12 = vmul.f32 %v3039_v23, %v460_v58 }
 0x158   :  { %v1521_v10 = vmul.f32 %v3044_v27, %v419_v62  ;;  %v3097_v18 = vmul.f32 %v3044_v27, %v462_v63 }
 0x159   :  { %v1645_v25 = vmul.f32 %v3044_v27, %v421_v5 }
 0x15b   :  { %v500_v46 = vpop.f32.mrb[8].mxu0  ;;  %v747_v47 = vpop.f32.mrb[8].mxu1 }
 0x15c   :  { %v748_v52 = vadd.f32 %v747_v47, %v558_v15  ;;  %v502_v53 = vpop.f32.mrb[9].mxu0  ;;  %v749_v55 = vpop.f32.mrb[9].mxu1  ;;  %v501_v26 = vadd.f32 %v500_v46, %v3032_v14 }
 0x15d   :  { %v750_v59 = vadd.f32 %v749_v55, %v562_v21  ;;  %v504_v60 = vpop.f32.mrb[10].mxu0  ;;  %v751_v54 = vpop.f32.mrb[10].mxu1  ;;  %v503_v28 = vadd.f32 %v502_v53, %v3034_v20 }
 0x15e   :  { %v1019_v0 = vmul.f32 %v3071_v48, %v748_v52  ;;  %v752_v1 = vadd.f32 %v751_v54, %v558_v15  ;;  %v506_v2 = vpop.f32.mrb[11].mxu0  ;;  %v753_v3 = vpop.f32.mrb[11].mxu1  ;;  %v505_v45 = vadd.f32 %v504_v60, %v3032_v14 }
 0x15f   :  { %v1160_v8 = vmul.f32 %v3071_v48, %v750_v59  ;;  %v754_v16 = vadd.f32 %v753_v3, %v562_v21  ;;  %v464_v21 = vadd.f32 %v463_v19, %v3030_v11  ;;  %v507_v46 = vadd.f32 %v506_v2, %v3034_v20 }
 0x160   :  { %v1021_v22 = vadd.f32 %v1019_v0, %v1015_v36  ;;  %v1020_v6 = vmul.f32 %v3078_v61, %v752_v1 }
 0x161   :  { %v1162_v13 = vadd.f32 %v1160_v8, %v1156_v40  ;;  %v1161_v15 = vmul.f32 %v3078_v61, %v754_v16 }
 0x162   :  { %2427 = vmatprep.mubr.msk.f32.mxu0 %vm1029_vm1, %v1021_v22  ;;  %v3101_v24 = vadd.f32 %v1020_v6, %v1016_v42  ;;  %v2017_v6 = vmul.f32 %v3044_v27, %v505_v45 }
 0x163   :  { %v790_v32 = vpop.f32.mrb[12].mxu0  ;;  %v833_v36 = vpop.f32.mrb[12].mxu1  ;;  %2434 = vmatprep.mubr.msk.f32.mxu1 %vm1029_vm1, %v1162_v13  ;;  %v3107_v40 = vadd.f32 %v1161_v15, %v1157_v56 }
 0x164   :  { %v791_v11 = vadd.f32 %v790_v32, %v3046_v29  ;;  %v834_v19 = vadd.f32 %v833_v36, %v3048_v30  ;;  %v792_v42 = vpop.f32.mrb[13].mxu0  ;;  %v835_v47 = vpop.f32.mrb[13].mxu1  ;;  %v2574_v50 = vpack.i.bf16 %v3101_v24, %v1021_v22  ;;  %v2140_v22 = vmul.f32 %v3039_v23, %v503_v28 }
 0x165   :  { %v793_v51 = vadd.f32 %v792_v42, %v3050_v31  ;;  %v836_v52 = vadd.f32 %v835_v47, %v3052_v33  ;;  %v794_v53 = vpop.f32.mrb[14].mxu0  ;;  %v837_v55 = vpop.f32.mrb[14].mxu1  ;;  %v2579_v56 = vpack.i.bf16 %v3107_v40, %v1162_v13  ;;  %v2141_v28 = vmul.f32 %v3044_v27, %v507_v46 }
 0x166   :  { %v1276_v14 = vmul.f32 %v3071_v48, %v791_v11  ;;  %v1524_v57 = vmul.f32 %v3071_v48, %v834_v19  ;;  %v795_v58 = vadd.f32 %v794_v53, %v3046_v29  ;;  %v838_v59 = vadd.f32 %v837_v55, %v3048_v30  ;;  %v796_v60 = vpop.f32.mrb[15].mxu0  ;;  %v839_v54 = vpop.f32.mrb[15].mxu1  ;;  %2575 = vrot.lane.b32.xlu0 %v2574_v50, %s2855_s3 }
 0x167   :  { %v1400_v20 = vmul.f32 %v3071_v48, %v793_v51  ;;  %v1648_v62 = vmul.f32 %v3071_v48, %v836_v52  ;;  %v797_v63 = vadd.f32 %v796_v60, %v3050_v31  ;;  %v840_v0 = vadd.f32 %v839_v54, %v3052_v33 }
 0x168   :  { %v1277_v1 = vmul.f32 %v3078_v61, %v795_v58  ;;  %v1525_v2 = vmul.f32 %v3078_v61, %v838_v59  ;;  %v3129_v29 = vadd.f32 %v1276_v14, %v3060_v37  ;;  %v3131_v30 = vadd.f32 %v1524_v57, %v1520_v9 }
 0x169   :  { %v1401_v3 = vmul.f32 %v3078_v61, %v797_v63  ;;  %v1649_v5 = vmul.f32 %v3078_v61, %v840_v0  ;;  %v3136_v8 = vadd.f32 %v1400_v20, %v3068_v41  ;;  %v3138_v16 = vadd.f32 %v1648_v62, %v1644_v7  ;;  %v2338_v62 = vld [vmem:[%s3421_s7 + $0x1] ss:$0 sm:$0xff] }
 0x16a   :  { %v1893_v31 = vmul.f32 %v3044_v27, %v464_v21  ;;  %v2016_v33 = vmul.f32 %v3039_v23, %v501_v26  ;;  %2580 = vrot.lane.b32.xlu0 %v2579_v56, %s2855_s3  ;;  %v3144_v37 = vadd.f32 %v1277_v1, %v3074_v49  ;;  %v3146_v9 = vadd.f32 %v1525_v2, %v1521_v10  ;;  %v3225_v2 = vld [vmem:[%s3421_s7] ss:$0 sm:$0xff]  ;;  %s2864_s7 = smov 120  }
 0x16b   :  { %v876_v13 = vpop.f32.mrb[16].mxu0  ;;  %v919_v41 = vpop.f32.mrb[16].mxu1  ;;  %v3151_v7 = vadd.f32 %v1401_v3, %v3082_v4  ;;  %v3153_v15 = vadd.f32 %v1649_v5, %v1645_v25  ;;  %v954_v63 = vadd.s32 8, %v3020_v44  ;;  %v3220_v0 = vand.u32 127, %v135_v43 }
 0x16c   :  { %v877_v21 = vadd.f32 %v876_v13, %v3054_v34  ;;  %v920_v26 = vadd.f32 %v919_v41, %v3056_v35  ;;  %v878_v32 = vpop.f32.mrb[17].mxu0  ;;  %v921_v49 = vpop.f32.mrb[17].mxu1  ;;  %v2584_v10 = vpack.i.bf16 %v3144_v37, %v3129_v29  ;;  %v2594_v23 = vpack.i.bf16 %v3146_v9, %v3131_v30 }
 0x16d   :  { %v879_v36 = vadd.f32 %v878_v32, %v3062_v38  ;;  %v922_v4 = vadd.f32 %v921_v49, %v3064_v39  ;;  %v880_v25 = vpop.f32.mrb[18].mxu0  ;;  %v923_v45 = vpop.f32.mrb[18].mxu1  ;;  %v2589_v11 = vpack.i.bf16 %v3151_v7, %v3136_v8  ;;  %v2599_v54 = vpack.i.bf16 %v3153_v15, %v3138_v16 }
 0x16e   :  { %v1772_v19 = vmul.f32 %v3071_v48, %v877_v21  ;;  %v2020_v42 = vmul.f32 %v3071_v48, %v920_v26  ;;  %v881_v47 = vadd.f32 %v880_v25, %v3054_v34  ;;  %v924_v50 = vadd.f32 %v923_v45, %v3056_v35  ;;  %v882_v51 = vpop.f32.mrb[19].mxu0  ;;  %v925_v52 = vpop.f32.mrb[19].mxu1  ;;  %2585 = vrot.lane.b32.xlu1 %v2584_v10, %s2855_s3 }
 0x16f   :  { %v1896_v27 = vmul.f32 %v3071_v48, %v879_v36  ;;  %v2144_v46 = vmul.f32 %v3071_v48, %v922_v4  ;;  %v883_v53 = vadd.f32 %v882_v51, %v3062_v38  ;;  %v926_v55 = vadd.f32 %v925_v52, %v3064_v39  ;;  %2595 = vrot.lane.b32.xlu0 %v2594_v23, %s2855_s3 }
 0x170   :  { %v1773_v56 = vmul.f32 %v3078_v61, %v881_v47  ;;  %v2021_v34 = vmul.f32 %v3078_v61, %v924_v50  ;;  %v3179_v35 = vadd.f32 %v1772_v19, %v3087_v17  ;;  %v3181_v14 = vadd.f32 %v2020_v42, %v2016_v33 }
 0x171   :  { %v1897_v57 = vmul.f32 %v3078_v61, %v883_v53  ;;  %v2145_v58 = vmul.f32 %v3078_v61, %v926_v55  ;;  %v3186_v48 = vadd.f32 %v1896_v27, %v3092_v12  ;;  %v3188_v38 = vadd.f32 %v2144_v46, %v2140_v22 }
 0x172   :  { %2590 = vrot.lane.b32.xlu1 %v2589_v11, %s2855_s3  ;;  %v3192_v39 = vadd.f32 %v1773_v56, %v3097_v18  ;;  %v3194_v59 = vadd.f32 %v2021_v34, %v2017_v6  ;;  %v1006_v1 = vmul.f32 0.125, %v2338_v62  ;;  %v2342_v3 = vadd.f32 -1.0, %v2338_v62 }
 0x173   :  { %v3196_v17 = vadd.f32 %v1897_v57, %v1893_v31  ;;  %v3198_v60 = vadd.f32 %v2145_v58, %v2141_v28  ;;  %v986_v5 = vand.u32 7, %v954_v63  ;;  %v1005_v31 = vmul.f32 0.125, %v3225_v2 }
 0x174   :  { %v2604_v61 = vpack.i.bf16 %v3192_v39, %v3179_v35  ;;  %v2614_v18 = vpack.i.bf16 %v3194_v59, %v3181_v14  ;;  %v2863_v33 = vmov 0.0  }
 0x175   :  { %v2609_v12 = vpack.i.bf16 %v3196_v17, %v3186_v48  ;;  %v2619_v20 = vpack.i.bf16 %v3198_v60, %v3188_v38  ;;  %vm1000_vm2 = vcmp.gt.s32.totalorder %v986_v5, %v3220_v0 }
 0x176   :  { %2600 = vrot.lane.b32.xlu1 %v2599_v54, %s2855_s3  ;;  %2605 = vrot.lane.b32.xlu0 %v2604_v61, %s2855_s3  ;;  %v2340_v43 = vsel %vm1000_vm2, 1.0, %v2863_v33 }
 0x177   :  { %v1010_v22 = vsub.f32 %v2342_v3, %v2340_v43 }
 0x179   :  { %v1012_v6 = vmul.f32 1.25e+11, %v1010_v22 }
 0x17a   :  { %2610 = vrot.lane.b32.xlu1 %v2609_v12, %s2855_s3  ;;  %2615 = vrot.lane.b32.xlu0 %v2614_v18, %s2855_s3 }
 0x17e   :  { %2620 = vrot.lane.b32.xlu1 %v2619_v20, %s2855_s3  ;;  %1127 = vrot.lane.b32.xlu0 %v1006_v1, %s2861_s27 }
 0x182   :  { %1125 = vrot.lane.b32.xlu1 %v1005_v31, %s2861_s27  ;;  %1137 = vrot.lane.b32.xlu0 %v1012_v6, %s2861_s27 }
 0x1d8   :  { %v2576_v13 = vpop.permute.xlu0 %2575 }
 0x1d9   :  { %v2578_v41 = vunpack.i.h.bf16 %v2576_v13  ;;  %v2577_v21 = vunpack.i.l.bf16 %v2576_v13 }
 0x1db   :  { %v2493_v32 = vpack.c.bf16 %v2578_v41, %v2577_v21 }
 0x1dc   :  { %v2581_v49 = vpop.permute.xlu0 %2580 }
 0x1dd   :  { %v2583_v10 = vunpack.i.h.bf16 %v2581_v49  ;;  %v2582_v23 = vunpack.i.l.bf16 %v2581_v49  ;;  %2495 = vmatprep.subr.msk.bf16.mxu0 %vm3235_vm3, %v2493_v32 }
 0x1de   :  { %2498 = vmatpush3.bf16.xpose.msk.msra.mxu0 %vm3235_vm3, %v2493_v32 }
 0x1df   :  { %v2499_v28 = vpack.c.bf16 %v2583_v10, %v2582_v23 }
 0x1e0   :  { %v2586_v36 = vpop.permute.xlu1 %2585 }
 0x1e1   :  { %v2588_v4 = vunpack.i.h.bf16 %v2586_v36  ;;  %v2587_v25 = vunpack.i.l.bf16 %v2586_v36  ;;  %v2596_v45 = vpop.permute.xlu0 %2595  ;;  %2501 = vmatprep.subr.msk.bf16.mxu1 %vm3235_vm3, %v2499_v28 }
 0x1e2   :  { %v2598_v11 = vunpack.i.h.bf16 %v2596_v45  ;;  %v2597_v19 = vunpack.i.l.bf16 %v2596_v45  ;;  %2504 = vmatpush3.bf16.xpose.msk.msra.mxu1 %vm3235_vm3, %v2499_v28 }
 0x1e3   :  { %v2505_v42 = vpack.c.bf16 %v2588_v4, %v2587_v25 }
 0x1e4   :  { %v2591_v47 = vpop.permute.xlu1 %2590  ;;  %v2517_v50 = vpack.c.bf16 %v2598_v11, %v2597_v19 }
 0x1e5   :  { %v2593_v51 = vunpack.i.h.bf16 %v2591_v47  ;;  %v2592_v52 = vunpack.i.l.bf16 %v2591_v47  ;;  %2428 = vmatmul.mubr.msk.f32.vlgmr.msra.gmra.mrb[20].mxu0 %vm1029_vm1, %v3101_v24  ;;  %2507 = vmatprep.subr.msk.bf16.mxu0 %vm3235_vm3, %v2505_v42 }
 0x1e6   :  { %2510 = vmatpush3.bf16.xpose.msk.msra.mxu0 %vm3235_vm3, %v2505_v42  ;;  %2441 = vmatprep.mubr.msk.f32.mxu0 %vm1029_vm1, %v3129_v29 }
 0x1e7   :  { %v2511_v27 = vpack.c.bf16 %v2593_v51, %v2592_v52  ;;  %2519 = vmatprep.subr.msk.bf16.mxu0 %vm3235_vm3, %v2517_v50 }
 0x1e8   :  { %v2601_v46 = vpop.permute.xlu1 %2600  ;;  %v2606_v53 = vpop.permute.xlu0 %2605 }
 0x1e9   :  { %v2603_v55 = vunpack.i.h.bf16 %v2601_v46  ;;  %v2602_v56 = vunpack.i.l.bf16 %v2601_v46  ;;  %v2608_v34 = vunpack.i.h.bf16 %v2606_v53  ;;  %v2607_v57 = vunpack.i.l.bf16 %v2606_v53  ;;  %2435 = vmatmul.mubr.msk.f32.vlgmr.msra.gmra.mrb[20].mxu1 %vm1029_vm1, %v3107_v40  ;;  %2513 = vmatprep.subr.msk.bf16.mxu1 %vm3235_vm3, %v2511_v27 }
 0x1ea   :  { %2516 = vmatpush3.bf16.xpose.msk.msra.mxu1 %vm3235_vm3, %v2511_v27  ;;  %2448 = vmatprep.mubr.msk.f32.mxu1 %vm1029_vm1, %v3136_v8 }
 0x1eb   :  { %v2523_v24 = vpack.c.bf16 %v2603_v55, %v2602_v56  ;;  %v2529_v58 = vpack.c.bf16 %v2608_v34, %v2607_v57 }
 0x1ec   :  { %v2611_v29 = vpop.permute.xlu1 %2610  ;;  %v2616_v40 = vpop.permute.xlu0 %2615 }
 0x1ed   :  { %v2613_v54 = vunpack.i.h.bf16 %v2611_v29  ;;  %v2612_v61 = vunpack.i.l.bf16 %v2611_v29  ;;  %2442 = vmatmul.mubr.msk.f32.vlgmr.msra.gmra.mrb[22].mxu0 %vm1029_vm1, %v3144_v37  ;;  %2525 = vmatprep.subr.msk.bf16.mxu1 %vm3235_vm3, %v2523_v24  ;;  %v2618_v12 = vunpack.i.h.bf16 %v2616_v40  ;;  %v2617_v18 = vunpack.i.l.bf16 %v2616_v40 }
 0x1ee   :  { %2522 = vmatpush3.bf16.xpose.msk.msra.mxu0 %vm3235_vm3, %v2517_v50  ;;  %2455 = vmatprep.mubr.msk.f32.mxu0 %vm1029_vm1, %v3131_v30 }
 0x1ef   :  { %2531 = vmatprep.subr.msk.bf16.mxu0 %vm3235_vm3, %v2529_v58  ;;  %v2535_v8 = vpack.c.bf16 %v2613_v54, %v2612_v61  ;;  %v2541_v30 = vpack.c.bf16 %v2618_v12, %v2617_v18 }
 0x1f0   :  { %v2621_v37 = vpop.permute.xlu1 %2620  ;;  %v3329_v6 = vpop.permute.xlu0 %1127 }
 0x1f1   :  { %2449 = vmatmul.mubr.msk.f32.vlgmr.msra.gmra.mrb[22].mxu1 %vm1029_vm1, %v3151_v7  ;;  %v2623_v20 = vunpack.i.h.bf16 %v2621_v37  ;;  %v2622_v62 = vunpack.i.l.bf16 %v2621_v37 }
 0x1f2   :  { %2528 = vmatpush3.bf16.xpose.msk.msra.mxu1 %vm3235_vm3, %v2523_v24  ;;  %2462 = vmatprep.mubr.msk.f32.mxu1 %vm1029_vm1, %v3138_v16  ;;  %v2341_v16 = vadd.f32 -1.0, %v3225_v2 }
 0x1f3   :  { %2537 = vmatprep.subr.msk.bf16.mxu1 %vm3235_vm3, %v2535_v8  ;;  %v2547_v7 = vpack.c.bf16 %v2623_v20, %v2622_v62 }
 0x1f4   :  { %v3333_v32 = vpop.permute.xlu0 %1137  ;;  %v1126_v55 = vpop.permute.xlu1 %1125 }
 0x1f5   :  { %2456 = vmatmul.mubr.msk.f32.vlgmr.msra.gmra.mrb[24].mxu0 %vm1029_vm1, %v3146_v9  ;;  %v979_v9 = vand.u32 7, %v3020_v44 }
 0x1f6   :  { %2534 = vmatpush3.bf16.xpose.msk.msra.mxu0 %vm3235_vm3, %v2529_v58  ;;  %2469 = vmatprep.mubr.msk.f32.mxu0 %vm1029_vm1, %v3179_v35 }
 0x1f7   :  { %2543 = vmatprep.subr.msk.bf16.mxu0 %vm3235_vm3, %v2541_v30  ;;  %vm999_vm4 = vcmp.gt.s32.totalorder %v979_v9, %v3220_v0 }
 0x1f9   :  { %2463 = vmatmul.mubr.msk.f32.vlgmr.msra.gmra.mrb[24].mxu1 %vm1029_vm1, %v3153_v15  ;;  %v2339_v15 = vsel %vm999_vm4, 1.0, %v2863_v33 }
 0x1fa   :  { %2540 = vmatpush3.bf16.xpose.msk.msra.mxu1 %vm3235_vm3, %v2535_v8  ;;  %2476 = vmatprep.mubr.msk.f32.mxu1 %vm1029_vm1, %v3186_v48  ;;  %v1009_v35 = vsub.f32 %v2341_v16, %v2339_v15 }
 0x1fb   :  { %2549 = vmatprep.subr.msk.bf16.mxu1 %vm3235_vm3, %v2547_v7 }
 0x1fd   :  { %2470 = vmatmul.mubr.msk.f32.vlgmr.msra.gmra.mrb[26].mxu0 %vm1029_vm1, %v3192_v39 }
 0x1fe   :  { %2546 = vmatpush3.bf16.xpose.msk.msra.mxu0 %vm3235_vm3, %v2541_v30  ;;  %2483 = vmatprep.mubr.msk.f32.mxu0 %vm1029_vm1, %v3181_v14  ;;  %v1011_v14 = vmul.f32 1.25e+11, %v1009_v35 }
 0x200   :  { %1135 = vrot.lane.b32.xlu1 %v1011_v14, %s2861_s27 }
 0x201   :  { %2477 = vmatmul.mubr.msk.f32.vlgmr.msra.gmra.mrb[26].mxu1 %vm1029_vm1, %v3196_v17 }
 0x202   :  { %2552 = vmatpush3.bf16.xpose.msk.msra.mxu1 %vm3235_vm3, %v2547_v7  ;;  %2490 = vmatprep.mubr.msk.f32.mxu1 %vm1029_vm1, %v3188_v38 }
 0x205   :  { %2484 = vmatmul.mubr.msk.f32.vlgmr.msra.gmra.mrb[28].mxu0 %vm1029_vm1, %v3194_v59 }
 0x209   :  { %2491 = vmatmul.mubr.msk.f32.vlgmr.msra.gmra.mrb[28].mxu1 %vm1029_vm1, %v3198_v60 }
 0x272   :  { %v1136_v34 = vpop.permute.xlu1 %1135 }
 0x2b8   :  { %v2429_v48 = vpop.f32.mrb[20].mxu0 }
 0x2b9   :  { %v1104_v38 = vpop.f32.mrb[21].mxu0  ;;  %v1132_v21 = vmul.f32 %v2429_v48, %v3329_v6 }
 0x2ba   :  { %1115 = vrot.lane.b32.xlu0 %v1104_v38, %s2861_s27 }
 0x2bb   :  { %v1142_v23 = vadd.f32 %v3333_v32, %v1132_v21 }
 0x2bc   :  { %v3321_v39 = vpop.f32.mrb[20].mxu1 }
 0x2bd   :  { %v1244_v59 = vpop.f32.mrb[21].mxu1 }
 0x2c0   :  { %v2443_v17 = vpop.f32.mrb[22].mxu0 }
 0x2c1   :  { %v1360_v60 = vpop.f32.mrb[23].mxu0  ;;  %v1380_v10 = vmul.f32 %v2443_v17, %v3329_v6  ;;  %v1264_v17 = vmul.f32 %v3321_v39, %v3329_v6 }
 0x2c2   :  { %1371 = vrot.lane.b32.xlu1 %v1360_v60, %s2861_s27 }
 0x2c3   :  { %v1382_v36 = vadd.f32 %v1380_v10, %v3333_v32 }
 0x2c4   :  { %v2450_v44 = vpop.f32.mrb[22].mxu1 }
 0x2c5   :  { %v1484_v63 = vpop.f32.mrb[23].mxu1  ;;  %v1504_v28 = vmul.f32 %v2450_v44, %v3329_v6 }
 0x2c6   :  { %1495 = vrot.lane.b32.xlu0 %v1484_v63, %s2861_s27 }
 0x2c7   :  { %v1506_v4 = vadd.f32 %v1504_v28, %v3333_v32 }
 0x2c8   :  { %v2457_v0 = vpop.f32.mrb[24].mxu0 }
 0x2c9   :  { %v1608_v1 = vpop.f32.mrb[25].mxu0  ;;  %v1628_v25 = vmul.f32 %v2457_v0, %v3329_v6 }
 0x2ca   :  { %1619 = vrot.lane.b32.xlu1 %v1608_v1, %s2861_s27 }
 0x2cb   :  { %v1630_v45 = vadd.f32 %v1628_v25, %v3333_v32 }
 0x2cc   :  { %v2464_v2 = vpop.f32.mrb[24].mxu1 }
 0x2cd   :  { %v1732_v3 = vpop.f32.mrb[25].mxu1  ;;  %v1752_v11 = vmul.f32 %v2464_v2, %v3329_v6 }
 0x2ce   :  { %1743 = vrot.lane.b32.xlu0 %v1732_v3, %s2861_s27  ;;  %v1266_v3 = vadd.f32 %v1264_v17, %v3333_v32 }
 0x2cf   :  { %v1754_v19 = vadd.f32 %v1752_v11, %v3333_v32 }
 0x2d0   :  { %v2471_v5 = vpop.f32.mrb[26].mxu0 }
 0x2d1   :  { %v1856_v31 = vpop.f32.mrb[27].mxu0  ;;  %v1876_v42 = vmul.f32 %v2471_v5, %v3329_v6 }
 0x2d2   :  { %1867 = vrot.lane.b32.xlu1 %v1856_v31, %s2861_s27 }
 0x2d3   :  { %v1878_v50 = vadd.f32 %v1876_v42, %v3333_v32 }
 0x2d4   :  { %v2478_v43 = vpop.f32.mrb[26].mxu1 }
 0x2d5   :  { %v1980_v22 = vpop.f32.mrb[27].mxu1  ;;  %v2000_v47 = vmul.f32 %v2478_v43, %v3329_v6 }
 0x2d6   :  { %1991 = vrot.lane.b32.xlu0 %v1980_v22, %s2861_s27 }
 0x2d7   :  { %v2002_v51 = vadd.f32 %v2000_v47, %v3333_v32 }
 0x2d8   :  { %v2485_v13 = vpop.f32.mrb[28].mxu0 }
 0x2d9   :  { %v2104_v41 = vpop.f32.mrb[29].mxu0  ;;  %v2124_v52 = vmul.f32 %v2485_v13, %v3329_v6 }
 0x2da   :  { %2115 = vrot.lane.b32.xlu1 %v2104_v41, %s2861_s27 }
 0x2db   :  { %v2126_v27 = vadd.f32 %v2124_v52, %v3333_v32 }
 0x2dc   :  { %v2492_v26 = vpop.f32.mrb[28].mxu1 }
 0x2dd   :  { %v2228_v49 = vpop.f32.mrb[29].mxu1  ;;  %v2248_v46 = vmul.f32 %v2492_v26, %v3329_v6 }
 0x2de   :  { %2239 = vrot.lane.b32.xlu0 %v2228_v49, %s2861_s27  ;;  %1255 = vrot.lane.b32.xlu1 %v1244_v59, %s2861_s27 }
 0x2df   :  { %v2250_v53 = vadd.f32 %v2248_v46, %v3333_v32 }
 0x2e2   :  { %1147 = vrot.lane.b32.xlu1 %v1142_v23, %s2864_s7 }
 0x2e6   :  { %1387 = vrot.lane.b32.xlu1 %v1382_v36, %s2861_s27 }
 0x2ea   :  { %1511 = vrot.lane.b32.xlu1 %v1506_v4, %s2865_s20 }
 0x2ee   :  { %1635 = vrot.lane.b32.xlu1 %v1630_v45, %s2866_s21 }
 0x2f2   :  { %1759 = vrot.lane.b32.xlu1 %v1754_v19, %s2867_s23 }
 0x2f6   :  { %1883 = vrot.lane.b32.xlu1 %v1878_v50, %s2852_s16 }
 0x2fa   :  { %2007 = vrot.lane.b32.xlu1 %v2002_v51, %s2868_s2 }
 0x2fe   :  { %2131 = vrot.lane.b32.xlu1 %v2126_v27, %s2869_s15 }
 0x302   :  { %2255 = vrot.lane.b32.xlu1 %v2250_v53, %s2855_s3 }
 0x32c   :  { %v1116_v56 = vpop.permute.xlu0 %1115 }
 0x32d   :  { %v1131_v57 = vmul.f32 %v1126_v55, %v1116_v56 }
 0x32f   :  { %v1141_v24 = vadd.f32 %v1136_v34, %v1131_v57 }
 0x331   :  { %1145 = vrot.lane.b32.xlu0 %v1141_v24, %s2864_s7 }
 0x334   :  { %v1372_v29 = vpop.permute.xlu1 %1371 }
 0x335   :  { %v1379_v58 = vmul.f32 %v1372_v29, %v1126_v55 }
 0x337   :  { %v1381_v54 = vadd.f32 %v1379_v58, %v1136_v34 }
 0x338   :  { %v1496_v61 = vpop.permute.xlu0 %1495 }
 0x339   :  { %v1503_v40 = vmul.f32 %v1496_v61, %v1126_v55  ;;  %1385 = vrot.lane.b32.xlu0 %v1381_v54, %s2861_s27 }
 0x33b   :  { %v1505_v8 = vadd.f32 %v1503_v40, %v1136_v34 }
 0x33c   :  { %v1620_v12 = vpop.permute.xlu1 %1619 }
 0x33d   :  { %v1627_v18 = vmul.f32 %v1620_v12, %v1126_v55  ;;  %1509 = vrot.lane.b32.xlu0 %v1505_v8, %s2865_s20 }
 0x33f   :  { %v1629_v37 = vadd.f32 %v1627_v18, %v1136_v34 }
 0x340   :  { %v1744_v30 = vpop.permute.xlu0 %1743 }
 0x341   :  { %v1751_v20 = vmul.f32 %v1744_v30, %v1126_v55  ;;  %1633 = vrot.lane.b32.xlu0 %v1629_v37, %s2866_s21 }
 0x343   :  { %v1753_v62 = vadd.f32 %v1751_v20, %v1136_v34 }
 0x344   :  { %v1868_v7 = vpop.permute.xlu1 %1867 }
 0x345   :  { %v1875_v16 = vmul.f32 %v1868_v7, %v1126_v55  ;;  %1757 = vrot.lane.b32.xlu0 %v1753_v62, %s2867_s23 }
 0x347   :  { %v1877_v9 = vadd.f32 %v1875_v16, %v1136_v34 }
 0x348   :  { %v1992_v15 = vpop.permute.xlu0 %1991 }
 0x349   :  { %v1999_v35 = vmul.f32 %v1992_v15, %v1126_v55  ;;  %1881 = vrot.lane.b32.xlu0 %v1877_v9, %s2852_s16  ;;  %s2870_s16 = smov [#allocation15]  }
 0x34b   :  { %v2001_v14 = vadd.f32 %v1999_v35, %v1136_v34 }
 0x34c   :  { %v2116_v48 = vpop.permute.xlu1 %2115 }
 0x34d   :  { %v2123_v38 = vmul.f32 %v2116_v48, %v1126_v55  ;;  %2005 = vrot.lane.b32.xlu0 %v2001_v14, %s2868_s2 }
 0x34f   :  { %v2125_v59 = vadd.f32 %v2123_v38, %v1136_v34 }
 0x350   :  { %v2240_v60 = vpop.permute.xlu0 %2239  ;;  %v1256_v44 = vpop.permute.xlu1 %1255 }
 0x351   :  { %v2247_v63 = vmul.f32 %v2240_v60, %v1126_v55  ;;  %v1263_v0 = vmul.f32 %v1256_v44, %v1126_v55  ;;  %2129 = vrot.lane.b32.xlu0 %v2125_v59, %s2869_s15 }
 0x353   :  { %v1265_v1 = vadd.f32 %v1263_v0, %v1136_v34  ;;  %v2249_v2 = vadd.f32 %v2247_v63, %v1136_v34 }
 0x354   :  { %v1148_v5 = vpop.permute.xlu1 %1147 }
 0x355   :  { %1153 = vst.msk [vmem:[#allocation15 + $0x8] sm:$0xff] %vm1151_vm5, %v1148_v5  ;;  %2253 = vrot.lane.b32.xlu0 %v2249_v2, %s2855_s3  ;;  %s2270_s3 = sshll.u32 %s2870_s16, 4  ;;  %s2271_s3 = int_to_ptr.vmem [resolvable:$true] %s2270_s3 }
 0x356   :  { %1269 = vst.msk [vmem:[#allocation15 + $0x8] sm:$0xff] %vm1267_vm6, %v1266_v3  ;;  %s2818_s24 = scalar_lea.vmem %s2271_s3, 256  ;;  %p2823_p7 = scmp.lt.s32.totalorder %s2271_s3, %s2271_s3 }
 0x357   :  { %p2819_p6 = scmp.ne.s32.totalorder %s2271_s3, %s2818_s24  ;;  %p2824_p8 = scmp.lt.s32.totalorder %s2818_s24, %s2818_s24 }
 0x358   :  { %v1388_v39 = vpop.permute.xlu1 %1387 }
 0x359   :  { %1393 = vst.msk [vmem:[#allocation15 + $0x8] sm:$0xff] %vm1391_vm7, %v1388_v39  ;;  %p2825_p9 = por %p2824_p8, %p2823_p7 }
 0x35b   :  { %p2826_p10 = pnand %p2825_p9, %p2819_p6 }
 0x35c   :  { %v1512_v31 = vpop.permute.xlu1 %1511 }
 0x35d   :  { %1517 = vst.msk [vmem:[#allocation15 + $0x8] sm:$0xff] %vm1515_vm8, %v1512_v31 }
 0x360   :  { %v1636_v43 = vpop.permute.xlu1 %1635 }
 0x361   :  { %1641 = vst.msk [vmem:[#allocation15 + $0x8] sm:$0xff] %vm1639_vm9, %v1636_v43 }
 0x364   :  { %v1760_v22 = vpop.permute.xlu1 %1759 }
 0x365   :  { %1765 = vst.msk [vmem:[#allocation15 + $0x8] sm:$0xff] %vm1763_vm10, %v1760_v22 }
 0x368   :  { %v1884_v6 = vpop.permute.xlu1 %1883 }
 0x369   :  { %1889 = vst.msk [vmem:[#allocation15 + $0x8] sm:$0xff] %vm1887_vm11, %v1884_v6 }
 0x36c   :  { %v2008_v13 = vpop.permute.xlu1 %2007 }
 0x36d   :  { %2013 = vst.msk [vmem:[#allocation15 + $0x8] sm:$0xff] %vm2011_vm12, %v2008_v13 }
 0x370   :  { %v2132_v41 = vpop.permute.xlu1 %2131 }
 0x371   :  { %2137 = vst.msk [vmem:[#allocation15 + $0x8] sm:$0xff] %vm2135_vm13, %v2132_v41 }
 0x374   :  { %v2256_v21 = vpop.permute.xlu1 %2255 }
 0x375   :  { %2261 = vst.msk [vmem:[#allocation15 + $0x8] sm:$0xff] %vm2259_vm14, %v2256_v21 }
 0x376   :  { %2264 = vst.msk [vmem:[#allocation15 + $0x8] sm:$0xff] %vm2262_vm15, %v2863_v33 }
 0x3a3   :  { %v1146_v26 = vpop.permute.xlu0 %1145 }
 0x3a4   :  { %1152 = vst.msk [vmem:[#allocation15] sm:$0xff] %vm1151_vm5, %v1146_v26 }
 0x3a5   :  { %1268 = vst.msk [vmem:[#allocation15] sm:$0xff] %vm1267_vm6, %v1265_v1 }
 0x3ab   :  { %v1386_v32 = vpop.permute.xlu0 %1385 }
 0x3ac   :  { %1392 = vst.msk [vmem:[#allocation15] sm:$0xff] %vm1391_vm7, %v1386_v32 }
 0x3af   :  { %v1510_v49 = vpop.permute.xlu0 %1509 }
 0x3b0   :  { %1516 = vst.msk [vmem:[#allocation15] sm:$0xff] %vm1515_vm8, %v1510_v49 }
 0x3b3   :  { %v1634_v10 = vpop.permute.xlu0 %1633 }
 0x3b4   :  { %1640 = vst.msk [vmem:[#allocation15] sm:$0xff] %vm1639_vm9, %v1634_v10 }
 0x3b7   :  { %v1758_v23 = vpop.permute.xlu0 %1757 }
 0x3b8   :  { %1764 = vst.msk [vmem:[#allocation15] sm:$0xff] %vm1763_vm10, %v1758_v23 }
 0x3bb   :  { %v1882_v28 = vpop.permute.xlu0 %1881 }
 0x3bc   :  { %1888 = vst.msk [vmem:[#allocation15] sm:$0xff] %vm1887_vm11, %v1882_v28 }
 0x3bf   :  { %v2006_v36 = vpop.permute.xlu0 %2005 }
 0x3c0   :  { %2012 = vst.msk [vmem:[#allocation15] sm:$0xff] %vm2011_vm12, %v2006_v36 }
 0x3c3   :  { %v2130_v4 = vpop.permute.xlu0 %2129 }
 0x3c4   :  { %2136 = vst.msk [vmem:[#allocation15] sm:$0xff] %vm2135_vm13, %v2130_v4 }
 0x3c7   :  { %v2254_v25 = vpop.permute.xlu0 %2253 }
 0x3c8   :  { %2260 = vst.msk [vmem:[#allocation15] sm:$0xff] %vm2259_vm14, %v2254_v25 }
 0x3c9   :  { %2263 = vst.msk [vmem:[#allocation15] sm:$0xff] %vm2262_vm15, %v2863_v33 }
 0x3ca   :  { %2829 = shalt.err (!%p2826_p10)
}
 0x3cb   :  { %s2830_s29 = scalar_lea.hbm %s3422_s8, 256 }
 0x3cc   :  { %p2831_p11 = scmp.ne.s32.totalorder %s3422_s8, %s2830_s29  ;;  %p2834_p12 = scmp.lt.u32.totalorder %s2830_s29, %s3422_s8 }
 0x3ce   :  { %p2836_p13 = pnand %p2834_p12, %p2831_p11 }
 0x3d0   :  { %2839 = shalt.err (!%p2836_p13)
}
 0x3d1   :  { %2276 = dma.vmem_to_hbm [thread:$0]  %s2271_s3, 256, %s3422_s8, [#allocation6], %s2860_s4, %s2860_s4, %s2861_s27  }
 0x3d2   :  { %2848 = dma.done.wait [#allocation6], 256  }
 0x3d3   :  { %2849 = vsyncadd [#allocation6], 4294967040 }
 0x3d4   :  { %2280 = vsyncpa [#allocation5], 1 }
 0x3d5   :  { %2281 = vsyncpa [#allocation8], 1 }
 0x3d6   :  { %2282 = vsyncpa [#allocation11], 1 }
 0x3d7   :  { %2283 = vsyncpa [#allocation14], 1 }
 0x3d8   :  { %2284 = vsyncpa [#allocation6], 1 }

</bundles_post_ra>
